<compile_context>
chip_gen: v6e
topology: v6e:2x2x1
jax: 0.10.0
libtpu: 0.0.40
codegen_flags: <defaults>
</compile_context>

<pallas_src>
import jax
import jax.numpy as jnp
from jax.experimental import pallas as pl
from jax.experimental.pallas import tpu as pltpu

HEAD_PAD = 128     # lane width of the fused head slab (theta / 4PL params)
PROB_LANE = 4      # lane of `prob`  inside the packed scalar output slab
THETA_LANE = 5     # lane of `theta` inside the packed scalar output slab


def _round_up(x, m):
    return ((x + m - 1) // m) * m


# --------------------------------------------------------------------------- #
# Kernel
# --------------------------------------------------------------------------- #
def irt_kernel(
    student_ref, item_ref,
    sw1_ref, sb1_ref, w2s_ref, b2s_ref,      # student branch (layer2 fused w/ ability head)
    iw1_ref, ib1_ref, w2i_ref, b2i_ref,      # item branch (layer2 fused w/ 4PL-param head)
    semb_ref, iemb_ref, small_ref,           # outputs
):
    f32 = jnp.float32
    e_dim = semb_ref.shape[1]                # padded embedding dim (multiple of 128)

    # ---- student branch: Linear -> ReLU -> fused(Linear + ability head) ----
    h_s = jnp.dot(student_ref[...], sw1_ref[...], preferred_element_type=f32)
    h_s = jnp.maximum(h_s + sb1_ref[...], 0.0)
    out_s = jnp.dot(h_s.astype(w2s_ref.dtype), w2s_ref[...],
                    preferred_element_type=f32) + b2s_ref[...]
    semb_ref[...] = out_s[:, :e_dim].astype(semb_ref.dtype)
    theta = out_s[:, e_dim:e_dim + 1]

    # ---- item branch: Linear -> ReLU -> fused(Linear + param head) ---------
    h_i = jnp.dot(item_ref[...], iw1_ref[...], preferred_element_type=f32)
    h_i = jnp.maximum(h_i + ib1_ref[...], 0.0)
    out_i = jnp.dot(h_i.astype(w2i_ref.dtype), w2i_ref[...],
                    preferred_element_type=f32) + b2i_ref[...]
    iemb_ref[...] = out_i[:, :e_dim].astype(iemb_ref.dtype)

    # Head slab: raw 4PL params already sit in lanes 0..3 (fused-head weights
    # are zero-padded to 128 lanes), so no concatenate / fresh zeros needed.
    head = out_i[:, e_dim:]                  # (tb, HEAD_PAD), f32
    beta = head[:, 0:1]
    a = head[:, 1:2]
    c = jax.nn.sigmoid(head[:, 2:3])
    d = jax.nn.sigmoid(head[:, 3:4])
    prob = c + (d - c) * jax.nn.sigmoid(a * (theta - beta))

    # ---- insert prob/theta into fixed pad lanes; single unmasked store ------
    lane = jax.lax.broadcasted_iota(jnp.int32, head.shape, 1)
    slab = jnp.where(lane == PROB_LANE, jnp.broadcast_to(prob, head.shape), head)
    slab = jnp.where(lane == THETA_LANE, jnp.broadcast_to(theta, head.shape), slab)
    small_ref[...] = slab


# --------------------------------------------------------------------------- #
# Host-side parameter preparation (lane padding + head fusion)
# --------------------------------------------------------------------------- #
def init_params(key, num_students, num_items, hidden_dim, embedding_dim):
    """Raw (transposed, (in,out)) weights; matches torch nn.Linear default init."""
    ks = jax.random.split(key, 12)

    def lin(kw, kb, fan_in, fan_out):
        bound = 1.0 / jnp.sqrt(jnp.float32(fan_in))
        w = jax.random.uniform(kw, (fan_in, fan_out), jnp.float32, -bound, bound)
        b = jax.random.uniform(kb, (1, fan_out), jnp.float32, -bound, bound)
        return w, b

    sw1, sb1 = lin(ks[0], ks[1], num_students, hidden_dim)
    sw2, sb2 = lin(ks[2], ks[3], hidden_dim, embedding_dim)
    aw, ab = lin(ks[4], ks[5], embedding_dim, 1)
    iw1, ib1 = lin(ks[6], ks[7], num_items, hidden_dim)
    iw2, ib2 = lin(ks[8], ks[9], hidden_dim, embedding_dim)
    pw, pb = lin(ks[10], ks[11], embedding_dim, 4)

    return dict(sw1=sw1, sb1=sb1, sw2=sw2, sb2=sb2, aw=aw, ab=ab,
                iw1=iw1, ib1=ib1, iw2=iw2, ib2=ib2, pw=pw, pb=pb)


def prepare_params(p, *, compute_dtype=jnp.bfloat16):
    """Pad all feature dims to lane-dense multiples of 128 and fuse the heads."""
    Ns, H = p["sw1"].shape
    Ni = p["iw1"].shape[0]
    E = p["sw2"].shape[1]
    Nsp, Nip = _round_up(Ns, 128), _round_up(Ni, 128)
    Hp, Ep = _round_up(H, 128), _round_up(E, 128)

    def pad_to(w, rows, cols):
        return jnp.pad(w, ((0, rows - w.shape[0]), (0, cols - w.shape[1])))

    def branch(w1, b1, w2, b2, hw, hb, n_in_pad):
        # zero-padded rows/cols contribute exactly 0 -> numerically identical
        w1p = pad_to(w1, n_in_pad, Hp)
        b1p = pad_to(b1, 1, Hp)
        w2p = pad_to(w2, Hp, E)               # pad hidden rows for head fusion
        head_w = w2p @ hw                     # (Hp, n_head)
        head_b = b2 @ hw + hb                 # (1,  n_head)
        w2f = jnp.concatenate([pad_to(w2p, Hp, Ep),
                               pad_to(head_w, Hp, HEAD_PAD)], axis=1)
        b2f = jnp.concatenate([pad_to(b2, 1, Ep),
                               pad_to(head_b, 1, HEAD_PAD)], axis=1)
        return w1p, b1p, w2f, b2f

    sw1, sb1, w2s, b2s = branch(p["sw1"], p["sb1"], p["sw2"], p["sb2"],
                                p["aw"], p["ab"], Nsp)
    iw1, ib1, w2i, b2i = branch(p["iw1"], p["ib1"], p["iw2"], p["ib2"],
                                p["pw"], p["pb"], Nip)

    cdt = compute_dtype
    return dict(
        sw1=sw1.astype(cdt), sb1=sb1.astype(jnp.float32),
        w2s=w2s.astype(cdt), b2s=b2s.astype(jnp.float32),
        iw1=iw1.astype(cdt), ib1=ib1.astype(jnp.float32),
        w2i=w2i.astype(cdt), b2i=b2i.astype(jnp.float32),
        e_dim=E,
    )


# --------------------------------------------------------------------------- #
# Wrapper
# --------------------------------------------------------------------------- #
def _pick_tile_b(B):
    """Batch tile: multiple of 256 for the v6e/v7x 256-wide MXU when B allows,
    and >= 2 grid steps when possible so v7x's two TensorCores both get work."""
    Bp8 = _round_up(B, 8)
    if Bp8 >= 1024:
        return 512
    if Bp8 >= 512:
        return 256
    if Bp8 >= 16:
        return _round_up((Bp8 + 1) // 2, 8)
    return Bp8


def irt_forward(student, item, p, *, tile_b=None):
    """Returns (prob, theta, params, student_embedding, item_embedding)."""
    B = student.shape[0]
    Nsp, Hp = p["sw1"].shape
    Nip = p["iw1"].shape[0]
    Fs = p["w2s"].shape[1]
    Ep = Fs - HEAD_PAD
    E = p["e_dim"]
    cdt = p["sw1"].dtype
    emb_dtype = cdt

    tb = _round_up(tile_b, 8) if tile_b is not None else _pick_tile_b(B)
    tb = min(tb, _round_up(B, 8))
    Bp = _round_up(B, tb)

    # Zero-pad inputs: columns to the 128-padded feature dims, rows to a tile
    # multiple. (bf16 cast is exact for one-hot IDs; see header note.)
    x_s = jnp.pad(student.astype(cdt), ((0, Bp - B), (0, Nsp - student.shape[1])))
    x_i = jnp.pad(item.astype(cdt), ((0, Bp - B), (0, Nip - item.shape[1])))

    weights = (p["sw1"], p["sb1"], p["w2s"], p["b2s"],
               p["iw1"], p["ib1"], p["w2i"], p["b2i"])

    flops = int(2 * Bp * Hp * (Nsp + Nip + 2 * Fs))
    transcendentals = int(3 * Bp)
    bytes_accessed = int(
        sum(int(a.size) * a.dtype.itemsize for a in (x_s, x_i) + weights)
        + Bp * (2 * Ep * jnp.dtype(emb_dtype).itemsize + HEAD_PAD * 4))

    def run(weight_mode):
        wkw = {} if weight_mode is None else dict(pipeline_mode=weight_mode)
        return pl.pallas_call(
            irt_kernel,
            out_shape=(
                jax.ShapeDtypeStruct((Bp, Ep), emb_dtype),           # student_embedding
                jax.ShapeDtypeStruct((Bp, Ep), emb_dtype),           # item_embedding
                jax.ShapeDtypeStruct((Bp, HEAD_PAD), jnp.float32),   # [params|prob|theta|0..]
            ),
            grid_spec=pltpu.PrefetchScalarGridSpec(
                num_scalar_prefetch=0,
                grid=(Bp // tb,),
                in_specs=[
                    pl.BlockSpec((tb, Nsp), lambda i: (i, 0)),
                    pl.BlockSpec((tb, Nip), lambda i: (i, 0)),
                    # weights: constant index maps -> fetched once, VMEM-resident;
                    # single-buffered (no 2x double-buffer VMEM cost).
                    pl.BlockSpec(p["sw1"].shape, lambda i: (0, 0), **wkw),
                    pl.BlockSpec(p["sb1"].shape, lambda i: (0, 0), **wkw),
                    pl.BlockSpec(p["w2s"].shape, lambda i: (0, 0), **wkw),
                    pl.BlockSpec(p["b2s"].shape, lambda i: (0, 0), **wkw),
                    pl.BlockSpec(p["iw1"].shape, lambda i: (0, 0), **wkw),
                    pl.BlockSpec(p["ib1"].shape, lambda i: (0, 0), **wkw),
                    pl.BlockSpec(p["w2i"].shape, lambda i: (0, 0), **wkw),
                    pl.BlockSpec(p["b2i"].shape, lambda i: (0, 0), **wkw),
                ],
                out_specs=[
                    pl.BlockSpec((tb, Ep), lambda i: (i, 0)),
                    pl.BlockSpec((tb, Ep), lambda i: (i, 0)),
                    pl.BlockSpec((tb, HEAD_PAD), lambda i: (i, 0)),
                ],
            ),
            compiler_params=pltpu.CompilerParams(
                dimension_semantics=("parallel",),
                vmem_limit_bytes=32 * 1024 * 1024,   # safe on v5e/v6e/v7x
            ),
            cost_estimate=pl.CostEstimate(
                flops=flops, transcendentals=transcendentals,
                bytes_accessed=bytes_accessed),
        )(x_s, x_i, *weights)

    try:
        semb, iemb, small = run(pl.Buffered(1))
    except Exception:
        # Fallback for jax versions where single-buffered pallas_call operands
        # (pipeline_mode=pl.Buffered(1)) are not supported.
        semb, iemb, small = run(None)

    prm = small[:B, 0:4]
    prob = small[:B, PROB_LANE:PROB_LANE + 1]
    theta = small[:B, THETA_LANE:THETA_LANE + 1]
    return prob, theta, prm, semb[:B, :E], iemb[:B, :E]


# --------------------------------------------------------------------------- #
# Pure-JAX reference of the PyTorch forward (raw, unfused weights)
# --------------------------------------------------------------------------- #
def irt_reference(student, item, p):
    h_s = jnp.maximum(student @ p["sw1"] + p["sb1"], 0.0)
    semb = h_s @ p["sw2"] + p["sb2"]
    h_i = jnp.maximum(item @ p["iw1"] + p["ib1"], 0.0)
    iemb = h_i @ p["iw2"] + p["ib2"]
    theta = semb @ p["aw"] + p["ab"]
    prm = iemb @ p["pw"] + p["pb"]
    beta, a = prm[:, 0:1], prm[:, 1:2]
    c, d = jax.nn.sigmoid(prm[:, 2:3]), jax.nn.sigmoid(prm[:, 3:4])
    prob = c + (d - c) * jax.nn.sigmoid(a * (theta - beta))
    return prob, theta, prm, semb, iemb


if __name__ == "__main__":
    batch = 64
    num_students = 100
    num_items = 50
    hidden_dim = 64          # module default
    embedding_dim = 128      # module default

    key = jax.random.PRNGKey(0)
    k_p, k_s, k_i = jax.random.split(key, 3)
    raw = init_params(k_p, num_students, num_items, hidden_dim, embedding_dim)

    s_idx = jax.random.randint(k_s, (batch,), 0, num_students)
    i_idx = jax.random.randint(k_i, (batch,), 0, num_items)
    student = jax.nn.one_hot(s_idx, num_students, dtype=jnp.float32)
    item = jax.nn.one_hot(i_idx, num_items, dtype=jnp.float32)

    names = ("prob", "theta", "params", "student_embedding", "item_embedding")
    refs = irt_reference(student, item, raw)

    # f32 path: verified tightly against the pure-JAX reference.
    prepared_f32 = prepare_params(raw, compute_dtype=jnp.float32)
    outs = jax.block_until_ready(irt_forward(student, item, prepared_f32))
    for n, o, r in zip(names, outs, refs):
        assert o.shape == r.shape and o.dtype == r.dtype, n
        assert jnp.allclose(o, r, atol=5e-4, rtol=5e-4), f"mismatch vs reference: {n}"

    # bf16 default path (bf16 weights/activations, f32 accumulation): half the
    # HBM/VMEM bytes + native MXU rate on all generations. Exact for one-hot
    # inputs up to bf16 weight rounding -> loose check + finiteness.
    prepared = prepare_params(raw)   # compute_dtype defaults to bf16
    outs_bf16 = jax.block_until_ready(irt_forward(student, item, prepared))
    for n, o, r in zip(names, outs_bf16, refs):
        assert o.shape == r.shape, n
        assert bool(jnp.isfinite(jnp.asarray(o, jnp.float32)).all()), n
    assert bool(jnp.allclose(outs_bf16[0].astype(jnp.float32), refs[0],
                             atol=5e-2)), "prob (bf16) too far from reference"

    print("KERNEL_OK")
</pallas_src>

<mosaic_0001>
module attributes {stable_mosaic.version = 11 : i64} {
  func.func @irt_kernel(%arg0: i32, %arg1: memref<32x128xf32, #tpu.memory_space<vmem>>, %arg2: memref<32x128xf32, #tpu.memory_space<vmem>>, %arg3: memref<128x128xf32, #tpu.memory_space<vmem>>, %arg4: memref<1x128xf32, #tpu.memory_space<vmem>>, %arg5: memref<128x256xf32, #tpu.memory_space<vmem>>, %arg6: memref<1x256xf32, #tpu.memory_space<vmem>>, %arg7: memref<128x128xf32, #tpu.memory_space<vmem>>, %arg8: memref<1x128xf32, #tpu.memory_space<vmem>>, %arg9: memref<128x256xf32, #tpu.memory_space<vmem>>, %arg10: memref<1x256xf32, #tpu.memory_space<vmem>>, %arg11: memref<32x128xf32, #tpu.memory_space<vmem>>, %arg12: memref<32x128xf32, #tpu.memory_space<vmem>>, %arg13: memref<32x128xf32, #tpu.memory_space<vmem>>) attributes {dimension_semantics = [#tpu.dimension_semantics<parallel>], iteration_bounds = array<i64: 2>, scalar_prefetch = 0 : i64, scratch_operands = 0 : i64, tpu.core_type = #tpu.core_type<tc>, window_params = [{transform_indices = @transform_0, window_bounds = array<i64: 32, 128>}, {transform_indices = @transform_1, window_bounds = array<i64: 32, 128>}, {pipeline_mode = #tpu.pipeline_mode<synchronous>, transform_indices = @transform_2, window_bounds = array<i64: 128, 128>}, {pipeline_mode = #tpu.pipeline_mode<synchronous>, transform_indices = @transform_3, window_bounds = array<i64: 1, 128>}, {pipeline_mode = #tpu.pipeline_mode<synchronous>, transform_indices = @transform_4, window_bounds = array<i64: 128, 256>}, {pipeline_mode = #tpu.pipeline_mode<synchronous>, transform_indices = @transform_5, window_bounds = array<i64: 1, 256>}, {pipeline_mode = #tpu.pipeline_mode<synchronous>, transform_indices = @transform_6, window_bounds = array<i64: 128, 128>}, {pipeline_mode = #tpu.pipeline_mode<synchronous>, transform_indices = @transform_7, window_bounds = array<i64: 1, 128>}, {pipeline_mode = #tpu.pipeline_mode<synchronous>, transform_indices = @transform_8, window_bounds = array<i64: 128, 256>}, {pipeline_mode = #tpu.pipeline_mode<synchronous>, transform_indices = @transform_9, window_bounds = array<i64: 1, 256>}, {transform_indices = @transform_10, window_bounds = array<i64: 32, 128>}, {transform_indices = @transform_11, window_bounds = array<i64: 32, 128>}, {transform_indices = @transform_12, window_bounds = array<i64: 32, 128>}]} {
    %c0 = arith.constant 0 : index
    %c0_0 = arith.constant 0 : index
    %0 = vector.load %arg1[%c0, %c0_0] : memref<32x128xf32, #tpu.memory_space<vmem>>, vector<32x128xf32>
    %c0_1 = arith.constant 0 : index
    %c0_2 = arith.constant 0 : index
    %1 = vector.load %arg3[%c0_1, %c0_2] : memref<128x128xf32, #tpu.memory_space<vmem>>, vector<128x128xf32>
    %cst = arith.constant dense<0.000000e+00> : vector<32x128xf32>
    %2 = tpu.matmul %0, %1, %cst {dimension_numbers = #tpu.dot_dimension_numbers<[1], [0], [0], [1], [0, 0, 1, 1], [], []>} : vector<32x128xf32>, vector<128x128xf32>, vector<32x128xf32> -> vector<32x128xf32>
    %c0_3 = arith.constant 0 : index
    %c0_4 = arith.constant 0 : index
    %3 = vector.load %arg4[%c0_3, %c0_4] : memref<1x128xf32, #tpu.memory_space<vmem>>, vector<1x128xf32>
    %4 = vector.broadcast %3 : vector<1x128xf32> to vector<32x128xf32>
    %5 = arith.addf %2, %4 : vector<32x128xf32>
    %cst_5 = arith.constant 0.000000e+00 : f32
    %6 = vector.broadcast %cst_5 : f32 to vector<32x128xf32>
    %7 = arith.maximumf %5, %6 : vector<32x128xf32>
    %c0_6 = arith.constant 0 : index
    %c0_7 = arith.constant 0 : index
    %8 = vector.load %arg5[%c0_6, %c0_7] : memref<128x256xf32, #tpu.memory_space<vmem>>, vector<128x256xf32>
    %cst_8 = arith.constant dense<0.000000e+00> : vector<32x256xf32>
    %9 = tpu.matmul %7, %8, %cst_8 {dimension_numbers = #tpu.dot_dimension_numbers<[1], [0], [0], [1], [0, 0, 1, 1], [], []>} : vector<32x128xf32>, vector<128x256xf32>, vector<32x256xf32> -> vector<32x256xf32>
    %c0_9 = arith.constant 0 : index
    %c0_10 = arith.constant 0 : index
    %10 = vector.load %arg6[%c0_9, %c0_10] : memref<1x256xf32, #tpu.memory_space<vmem>>, vector<1x256xf32>
    %11 = vector.broadcast %10 : vector<1x256xf32> to vector<32x256xf32>
    %12 = arith.addf %9, %11 : vector<32x256xf32>
    %13 = vector.extract_strided_slice %12 {offsets = [0, 0], sizes = [32, 128], strides = [1, 1]} : vector<32x256xf32> to vector<32x128xf32>
    %c0_11 = arith.constant 0 : index
    %c0_12 = arith.constant 0 : index
    %14 = vector.load %arg11[%c0_11, %c0_12] : memref<32x128xf32, #tpu.memory_space<vmem>>, vector<32x128xf32>
    tpu.vector_store %arg11[%c0_11, %c0_12], %13 {strides = array<i32>} : memref<32x128xf32, #tpu.memory_space<vmem>>, vector<32x128xf32>,
    %15 = vector.extract_strided_slice %12 {offsets = [0, 128], sizes = [32, 1], strides = [1, 1]} : vector<32x256xf32> to vector<32x1xf32>
    %c0_13 = arith.constant 0 : index
    %c0_14 = arith.constant 0 : index
    %16 = vector.load %arg2[%c0_13, %c0_14] : memref<32x128xf32, #tpu.memory_space<vmem>>, vector<32x128xf32>
    %c0_15 = arith.constant 0 : index
    %c0_16 = arith.constant 0 : index
    %17 = vector.load %arg7[%c0_15, %c0_16] : memref<128x128xf32, #tpu.memory_space<vmem>>, vector<128x128xf32>
    %cst_17 = arith.constant dense<0.000000e+00> : vector<32x128xf32>
    %18 = tpu.matmul %16, %17, %cst_17 {dimension_numbers = #tpu.dot_dimension_numbers<[1], [0], [0], [1], [0, 0, 1, 1], [], []>} : vector<32x128xf32>, vector<128x128xf32>, vector<32x128xf32> -> vector<32x128xf32>
    %c0_18 = arith.constant 0 : index
    %c0_19 = arith.constant 0 : index
    %19 = vector.load %arg8[%c0_18, %c0_19] : memref<1x128xf32, #tpu.memory_space<vmem>>, vector<1x128xf32>
    %20 = vector.broadcast %19 : vector<1x128xf32> to vector<32x128xf32>
    %21 = arith.addf %18, %20 : vector<32x128xf32>
    %cst_20 = arith.constant 0.000000e+00 : f32
    %22 = vector.broadcast %cst_20 : f32 to vector<32x128xf32>
    %23 = arith.maximumf %21, %22 : vector<32x128xf32>
    %c0_21 = arith.constant 0 : index
    %c0_22 = arith.constant 0 : index
    %24 = vector.load %arg9[%c0_21, %c0_22] : memref<128x256xf32, #tpu.memory_space<vmem>>, vector<128x256xf32>
    %cst_23 = arith.constant dense<0.000000e+00> : vector<32x256xf32>
    %25 = tpu.matmul %23, %24, %cst_23 {dimension_numbers = #tpu.dot_dimension_numbers<[1], [0], [0], [1], [0, 0, 1, 1], [], []>} : vector<32x128xf32>, vector<128x256xf32>, vector<32x256xf32> -> vector<32x256xf32>
    %c0_24 = arith.constant 0 : index
    %c0_25 = arith.constant 0 : index
    %26 = vector.load %arg10[%c0_24, %c0_25] : memref<1x256xf32, #tpu.memory_space<vmem>>, vector<1x256xf32>
    %27 = vector.broadcast %26 : vector<1x256xf32> to vector<32x256xf32>
    %28 = arith.addf %25, %27 : vector<32x256xf32>
    %29 = vector.extract_strided_slice %28 {offsets = [0, 0], sizes = [32, 128], strides = [1, 1]} : vector<32x256xf32> to vector<32x128xf32>
    %c0_26 = arith.constant 0 : index
    %c0_27 = arith.constant 0 : index
    %30 = vector.load %arg12[%c0_26, %c0_27] : memref<32x128xf32, #tpu.memory_space<vmem>>, vector<32x128xf32>
    tpu.vector_store %arg12[%c0_26, %c0_27], %29 {strides = array<i32>} : memref<32x128xf32, #tpu.memory_space<vmem>>, vector<32x128xf32>,
    %31 = vector.extract_strided_slice %28 {offsets = [0, 128], sizes = [32, 128], strides = [1, 1]} : vector<32x256xf32> to vector<32x128xf32>
    %32 = vector.extract_strided_slice %31 {offsets = [0, 0], sizes = [32, 1], strides = [1, 1]} : vector<32x128xf32> to vector<32x1xf32>
    %33 = vector.extract_strided_slice %31 {offsets = [0, 1], sizes = [32, 1], strides = [1, 1]} : vector<32x128xf32> to vector<32x1xf32>
    %34 = vector.extract_strided_slice %31 {offsets = [0, 2], sizes = [32, 1], strides = [1, 1]} : vector<32x128xf32> to vector<32x1xf32>
    %35 = arith.negf %34 : vector<32x1xf32>
    %36 = math.exp %35 : vector<32x1xf32>
    %cst_28 = arith.constant 1.000000e+00 : f32
    %37 = vector.broadcast %cst_28 : f32 to vector<32x1xf32>
    %38 = arith.addf %37, %36 : vector<32x1xf32>
    %39 = arith.divf %37, %38 : vector<32x1xf32>
    %40 = vector.extract_strided_slice %31 {offsets = [0, 3], sizes = [32, 1], strides = [1, 1]} : vector<32x128xf32> to vector<32x1xf32>
    %41 = arith.negf %40 : vector<32x1xf32>
    %42 = math.exp %41 : vector<32x1xf32>
    %cst_29 = arith.constant 1.000000e+00 : f32
    %43 = vector.broadcast %cst_29 : f32 to vector<32x1xf32>
    %44 = arith.addf %43, %42 : vector<32x1xf32>
    %45 = arith.divf %43, %44 : vector<32x1xf32>
    %46 = arith.subf %45, %39 : vector<32x1xf32>
    %47 = arith.subf %15, %32 : vector<32x1xf32>
    %48 = arith.mulf %33, %47 : vector<32x1xf32>
    %49 = arith.negf %48 : vector<32x1xf32>
    %50 = math.exp %49 : vector<32x1xf32>
    %cst_30 = arith.constant 1.000000e+00 : f32
    %51 = vector.broadcast %cst_30 : f32 to vector<32x1xf32>
    %52 = arith.addf %51, %50 : vector<32x1xf32>
    %53 = arith.divf %51, %52 : vector<32x1xf32>
    %54 = arith.mulf %46, %53 : vector<32x1xf32>
    %55 = arith.addf %39, %54 : vector<32x1xf32>
    %56 = tpu.iota {dimensions = array<i32: 1>} : vector<32x128xi32>
    %c4_i32 = arith.constant 4 : i32
    %57 = vector.broadcast %c4_i32 : i32 to vector<32x128xi32>
    %58 = arith.cmpi eq, %56, %57 : vector<32x128xi32>
    %59 = vector.shape_cast %55 : vector<32x1xf32> to vector<32x1xf32>
    %60 = vector.broadcast %59 : vector<32x1xf32> to vector<32x128xf32>
    %61 = arith.select %58, %60, %31 : vector<32x128xi1>, vector<32x128xf32>
    %c5_i32 = arith.constant 5 : i32
    %62 = vector.broadcast %c5_i32 : i32 to vector<32x128xi32>
    %63 = arith.cmpi eq, %56, %62 : vector<32x128xi32>
    %64 = vector.shape_cast %15 : vector<32x1xf32> to vector<32x1xf32>
    %65 = vector.broadcast %64 : vector<32x1xf32> to vector<32x128xf32>
    %66 = arith.select %63, %65, %61 : vector<32x128xi1>, vector<32x128xf32>
    %c0_31 = arith.constant 0 : index
    %c0_32 = arith.constant 0 : index
    %67 = vector.load %arg13[%c0_31, %c0_32] : memref<32x128xf32, #tpu.memory_space<vmem>>, vector<32x128xf32>
    tpu.vector_store %arg13[%c0_31, %c0_32], %66 {strides = array<i32>} : memref<32x128xf32, #tpu.memory_space<vmem>>, vector<32x128xf32>,
    return
  }
  func.func @transform_0(%arg0: i32) -> (i32, i32) {
    %c0_i32 = arith.constant 0 : i32
    %c0_i32_0 = arith.constant 0 : i32
    return %arg0, %c0_i32 : i32, i32
  }
  func.func @transform_1(%arg0: i32) -> (i32, i32) {
    %c0_i32 = arith.constant 0 : i32
    %c0_i32_0 = arith.constant 0 : i32
    return %arg0, %c0_i32 : i32, i32
  }
  func.func @transform_2(%arg0: i32) -> (i32, i32) {
    %c0_i32 = arith.constant 0 : i32
    %c0_i32_0 = arith.constant 0 : i32
    %c0_i32_1 = arith.constant 0 : i32
    return %c0_i32, %c0_i32_0 : i32, i32
  }
  func.func @transform_3(%arg0: i32) -> (i32, i32) {
    %c0_i32 = arith.constant 0 : i32
    %c0_i32_0 = arith.constant 0 : i32
    %c0_i32_1 = arith.constant 0 : i32
    return %c0_i32, %c0_i32_0 : i32, i32
  }
  func.func @transform_4(%arg0: i32) -> (i32, i32) {
    %c0_i32 = arith.constant 0 : i32
    %c0_i32_0 = arith.constant 0 : i32
    %c0_i32_1 = arith.constant 0 : i32
    return %c0_i32, %c0_i32_0 : i32, i32
  }
  func.func @transform_5(%arg0: i32) -> (i32, i32) {
    %c0_i32 = arith.constant 0 : i32
    %c0_i32_0 = arith.constant 0 : i32
    %c0_i32_1 = arith.constant 0 : i32
    return %c0_i32, %c0_i32_0 : i32, i32
  }
  func.func @transform_6(%arg0: i32) -> (i32, i32) {
    %c0_i32 = arith.constant 0 : i32
    %c0_i32_0 = arith.constant 0 : i32
    %c0_i32_1 = arith.constant 0 : i32
    return %c0_i32, %c0_i32_0 : i32, i32
  }
  func.func @transform_7(%arg0: i32) -> (i32, i32) {
    %c0_i32 = arith.constant 0 : i32
    %c0_i32_0 = arith.constant 0 : i32
    %c0_i32_1 = arith.constant 0 : i32
    return %c0_i32, %c0_i32_0 : i32, i32
  }
  func.func @transform_8(%arg0: i32) -> (i32, i32) {
    %c0_i32 = arith.constant 0 : i32
    %c0_i32_0 = arith.constant 0 : i32
    %c0_i32_1 = arith.constant 0 : i32
    return %c0_i32, %c0_i32_0 : i32, i32
  }
  func.func @transform_9(%arg0: i32) -> (i32, i32) {
    %c0_i32 = arith.constant 0 : i32
    %c0_i32_0 = arith.constant 0 : i32
    %c0_i32_1 = arith.constant 0 : i32
    return %c0_i32, %c0_i32_0 : i32, i32
  }
  func.func @transform_10(%arg0: i32) -> (i32, i32) {
    %c0_i32 = arith.constant 0 : i32
    %c0_i32_0 = arith.constant 0 : i32
    return %arg0, %c0_i32 : i32, i32
  }
  func.func @transform_11(%arg0: i32) -> (i32, i32) {
    %c0_i32 = arith.constant 0 : i32
    %c0_i32_0 = arith.constant 0 : i32
    return %arg0, %c0_i32 : i32, i32
  }
  func.func @transform_12(%arg0: i32) -> (i32, i32) {
    %c0_i32 = arith.constant 0 : i32
    %c0_i32_0 = arith.constant 0 : i32
    return %arg0, %c0_i32 : i32, i32
  }
}

module attributes {stable_mosaic.version = 11 : i64} {
  func.func @irt_kernel(%arg0: i32, %arg1: memref<32x128xf32, #tpu.memory_space<vmem>>, %arg2: memref<32x128xf32, #tpu.memory_space<vmem>>, %arg3: memref<128x128xf32, #tpu.memory_space<vmem>>, %arg4: memref<1x128xf32, #tpu.memory_space<vmem>>, %arg5: memref<128x256xf32, #tpu.memory_space<vmem>>, %arg6: memref<1x256xf32, #tpu.memory_space<vmem>>, %arg7: memref<128x128xf32, #tpu.memory_space<vmem>>, %arg8: memref<1x128xf32, #tpu.memory_space<vmem>>, %arg9: memref<128x256xf32, #tpu.memory_space<vmem>>, %arg10: memref<1x256xf32, #tpu.memory_space<vmem>>, %arg11: memref<32x128xf32, #tpu.memory_space<vmem>>, %arg12: memref<32x128xf32, #tpu.memory_space<vmem>>, %arg13: memref<32x128xf32, #tpu.memory_space<vmem>>) attributes {dimension_semantics = [#tpu.dimension_semantics<parallel>], iteration_bounds = array<i64: 2>, scalar_prefetch = 0 : i64, scratch_operands = 0 : i64, tpu.core_type = #tpu.core_type<tc>, window_params = [{transform_indices = @transform_0, window_bounds = array<i64: 32, 128>}, {transform_indices = @transform_1, window_bounds = array<i64: 32, 128>}, {pipeline_mode = #tpu.pipeline_mode<synchronous>, transform_indices = @transform_2, window_bounds = array<i64: 128, 128>}, {pipeline_mode = #tpu.pipeline_mode<synchronous>, transform_indices = @transform_3, window_bounds = array<i64: 1, 128>}, {pipeline_mode = #tpu.pipeline_mode<synchronous>, transform_indices = @transform_4, window_bounds = array<i64: 128, 256>}, {pipeline_mode = #tpu.pipeline_mode<synchronous>, transform_indices = @transform_5, window_bounds = array<i64: 1, 256>}, {pipeline_mode = #tpu.pipeline_mode<synchronous>, transform_indices = @transform_6, window_bounds = array<i64: 128, 128>}, {pipeline_mode = #tpu.pipeline_mode<synchronous>, transform_indices = @transform_7, window_bounds = array<i64: 1, 128>}, {pipeline_mode = #tpu.pipeline_mode<synchronous>, transform_indices = @transform_8, window_bounds = array<i64: 128, 256>}, {pipeline_mode = #tpu.pipeline_mode<synchronous>, transform_indices = @transform_9, window_bounds = array<i64: 1, 256>}, {transform_indices = @transform_10, window_bounds = array<i64: 32, 128>}, {transform_indices = @transform_11, window_bounds = array<i64: 32, 128>}, {transform_indices = @transform_12, window_bounds = array<i64: 32, 128>}]} {
    %c0 = arith.constant 0 : index
    %c0_0 = arith.constant 0 : index
    %0 = vector.load %arg1[%c0, %c0_0] : memref<32x128xf32, #tpu.memory_space<vmem>>, vector<32x128xf32>
    %c0_1 = arith.constant 0 : index
    %c0_2 = arith.constant 0 : index
    %1 = vector.load %arg3[%c0_1, %c0_2] : memref<128x128xf32, #tpu.memory_space<vmem>>, vector<128x128xf32>
    %cst = arith.constant dense<0.000000e+00> : vector<32x128xf32>
    %2 = tpu.matmul %0, %1, %cst {dimension_numbers = #tpu.dot_dimension_numbers<[1], [0], [0], [1], [0, 0, 1, 1], [], []>} : vector<32x128xf32>, vector<128x128xf32>, vector<32x128xf32> -> vector<32x128xf32>
    %c0_3 = arith.constant 0 : index
    %c0_4 = arith.constant 0 : index
    %3 = vector.load %arg4[%c0_3, %c0_4] : memref<1x128xf32, #tpu.memory_space<vmem>>, vector<1x128xf32>
    %4 = vector.broadcast %3 : vector<1x128xf32> to vector<32x128xf32>
    %5 = arith.addf %2, %4 : vector<32x128xf32>
    %cst_5 = arith.constant 0.000000e+00 : f32
    %6 = vector.broadcast %cst_5 : f32 to vector<32x128xf32>
    %7 = arith.maximumf %5, %6 : vector<32x128xf32>
    %c0_6 = arith.constant 0 : index
    %c0_7 = arith.constant 0 : index
    %8 = vector.load %arg5[%c0_6, %c0_7] : memref<128x256xf32, #tpu.memory_space<vmem>>, vector<128x256xf32>
    %cst_8 = arith.constant dense<0.000000e+00> : vector<32x256xf32>
    %9 = tpu.matmul %7, %8, %cst_8 {dimension_numbers = #tpu.dot_dimension_numbers<[1], [0], [0], [1], [0, 0, 1, 1], [], []>} : vector<32x128xf32>, vector<128x256xf32>, vector<32x256xf32> -> vector<32x256xf32>
    %c0_9 = arith.constant 0 : index
    %c0_10 = arith.constant 0 : index
    %10 = vector.load %arg6[%c0_9, %c0_10] : memref<1x256xf32, #tpu.memory_space<vmem>>, vector<1x256xf32>
    %11 = vector.broadcast %10 : vector<1x256xf32> to vector<32x256xf32>
    %12 = arith.addf %9, %11 : vector<32x256xf32>
    %13 = vector.extract_strided_slice %12 {offsets = [0, 0], sizes = [32, 128], strides = [1, 1]} : vector<32x256xf32> to vector<32x128xf32>
    %c0_11 = arith.constant 0 : index
    %c0_12 = arith.constant 0 : index
    %14 = vector.load %arg11[%c0_11, %c0_12] : memref<32x128xf32, #tpu.memory_space<vmem>>, vector<32x128xf32>
    tpu.vector_store %arg11[%c0_11, %c0_12], %13 {strides = array<i32>} : memref<32x128xf32, #tpu.memory_space<vmem>>, vector<32x128xf32>,
    %15 = vector.extract_strided_slice %12 {offsets = [0, 128], sizes = [32, 1], strides = [1, 1]} : vector<32x256xf32> to vector<32x1xf32>
    %c0_13 = arith.constant 0 : index
    %c0_14 = arith.constant 0 : index
    %16 = vector.load %arg2[%c0_13, %c0_14] : memref<32x128xf32, #tpu.memory_space<vmem>>, vector<32x128xf32>
    %c0_15 = arith.constant 0 : index
    %c0_16 = arith.constant 0 : index
    %17 = vector.load %arg7[%c0_15, %c0_16] : memref<128x128xf32, #tpu.memory_space<vmem>>, vector<128x128xf32>
    %cst_17 = arith.constant dense<0.000000e+00> : vector<32x128xf32>
    %18 = tpu.matmul %16, %17, %cst_17 {dimension_numbers = #tpu.dot_dimension_numbers<[1], [0], [0], [1], [0, 0, 1, 1], [], []>} : vector<32x128xf32>, vector<128x128xf32>, vector<32x128xf32> -> vector<32x128xf32>
    %c0_18 = arith.constant 0 : index
    %c0_19 = arith.constant 0 : index
    %19 = vector.load %arg8[%c0_18, %c0_19] : memref<1x128xf32, #tpu.memory_space<vmem>>, vector<1x128xf32>
    %20 = vector.broadcast %19 : vector<1x128xf32> to vector<32x128xf32>
    %21 = arith.addf %18, %20 : vector<32x128xf32>
    %cst_20 = arith.constant 0.000000e+00 : f32
    %22 = vector.broadcast %cst_20 : f32 to vector<32x128xf32>
    %23 = arith.maximumf %21, %22 : vector<32x128xf32>
    %c0_21 = arith.constant 0 : index
    %c0_22 = arith.constant 0 : index
    %24 = vector.load %arg9[%c0_21, %c0_22] : memref<128x256xf32, #tpu.memory_space<vmem>>, vector<128x256xf32>
    %cst_23 = arith.constant dense<0.000000e+00> : vector<32x256xf32>
    %25 = tpu.matmul %23, %24, %cst_23 {dimension_numbers = #tpu.dot_dimension_numbers<[1], [0], [0], [1], [0, 0, 1, 1], [], []>} : vector<32x128xf32>, vector<128x256xf32>, vector<32x256xf32> -> vector<32x256xf32>
    %c0_24 = arith.constant 0 : index
    %c0_25 = arith.constant 0 : index
    %26 = vector.load %arg10[%c0_24, %c0_25] : memref<1x256xf32, #tpu.memory_space<vmem>>, vector<1x256xf32>
    %27 = vector.broadcast %26 : vector<1x256xf32> to vector<32x256xf32>
    %28 = arith.addf %25, %27 : vector<32x256xf32>
    %29 = vector.extract_strided_slice %28 {offsets = [0, 0], sizes = [32, 128], strides = [1, 1]} : vector<32x256xf32> to vector<32x128xf32>
    %c0_26 = arith.constant 0 : index
    %c0_27 = arith.constant 0 : index
    %30 = vector.load %arg12[%c0_26, %c0_27] : memref<32x128xf32, #tpu.memory_space<vmem>>, vector<32x128xf32>
    tpu.vector_store %arg12[%c0_26, %c0_27], %29 {strides = array<i32>} : memref<32x128xf32, #tpu.memory_space<vmem>>, vector<32x128xf32>,
    %31 = vector.extract_strided_slice %28 {offsets = [0, 128], sizes = [32, 128], strides = [1, 1]} : vector<32x256xf32> to vector<32x128xf32>
    %32 = vector.extract_strided_slice %31 {offsets = [0, 0], sizes = [32, 1], strides = [1, 1]} : vector<32x128xf32> to vector<32x1xf32>
    %33 = vector.extract_strided_slice %31 {offsets = [0, 1], sizes = [32, 1], strides = [1, 1]} : vector<32x128xf32> to vector<32x1xf32>
    %34 = vector.extract_strided_slice %31 {offsets = [0, 2], sizes = [32, 1], strides = [1, 1]} : vector<32x128xf32> to vector<32x1xf32>
    %35 = arith.negf %34 : vector<32x1xf32>
    %36 = math.exp %35 : vector<32x1xf32>
    %cst_28 = arith.constant 1.000000e+00 : f32
    %37 = vector.broadcast %cst_28 : f32 to vector<32x1xf32>
    %38 = arith.addf %37, %36 : vector<32x1xf32>
    %39 = arith.divf %37, %38 : vector<32x1xf32>
    %40 = vector.extract_strided_slice %31 {offsets = [0, 3], sizes = [32, 1], strides = [1, 1]} : vector<32x128xf32> to vector<32x1xf32>
    %41 = arith.negf %40 : vector<32x1xf32>
    %42 = math.exp %41 : vector<32x1xf32>
    %cst_29 = arith.constant 1.000000e+00 : f32
    %43 = vector.broadcast %cst_29 : f32 to vector<32x1xf32>
    %44 = arith.addf %43, %42 : vector<32x1xf32>
    %45 = arith.divf %43, %44 : vector<32x1xf32>
    %46 = arith.subf %45, %39 : vector<32x1xf32>
    %47 = arith.subf %15, %32 : vector<32x1xf32>
    %48 = arith.mulf %33, %47 : vector<32x1xf32>
    %49 = arith.negf %48 : vector<32x1xf32>
    %50 = math.exp %49 : vector<32x1xf32>
    %cst_30 = arith.constant 1.000000e+00 : f32
    %51 = vector.broadcast %cst_30 : f32 to vector<32x1xf32>
    %52 = arith.addf %51, %50 : vector<32x1xf32>
    %53 = arith.divf %51, %52 : vector<32x1xf32>
    %54 = arith.mulf %46, %53 : vector<32x1xf32>
    %55 = arith.addf %39, %54 : vector<32x1xf32>
    %56 = tpu.iota {dimensions = array<i32: 1>} : vector<32x128xi32>
    %c4_i32 = arith.constant 4 : i32
    %57 = vector.broadcast %c4_i32 : i32 to vector<32x128xi32>
    %58 = arith.cmpi eq, %56, %57 : vector<32x128xi32>
    %59 = vector.shape_cast %55 : vector<32x1xf32> to vector<32x1xf32>
    %60 = vector.broadcast %59 : vector<32x1xf32> to vector<32x128xf32>
    %61 = arith.select %58, %60, %31 : vector<32x128xi1>, vector<32x128xf32>
    %c5_i32 = arith.constant 5 : i32
    %62 = vector.broadcast %c5_i32 : i32 to vector<32x128xi32>
    %63 = arith.cmpi eq, %56, %62 : vector<32x128xi32>
    %64 = vector.shape_cast %15 : vector<32x1xf32> to vector<32x1xf32>
    %65 = vector.broadcast %64 : vector<32x1xf32> to vector<32x128xf32>
    %66 = arith.select %63, %65, %61 : vector<32x128xi1>, vector<32x128xf32>
    %c0_31 = arith.constant 0 : index
    %c0_32 = arith.constant 0 : index
    %67 = vector.load %arg13[%c0_31, %c0_32] : memref<32x128xf32, #tpu.memory_space<vmem>>, vector<32x128xf32>
    tpu.vector_store %arg13[%c0_31, %c0_32], %66 {strides = array<i32>} : memref<32x128xf32, #tpu.memory_space<vmem>>, vector<32x128xf32>,
    return
  }
  func.func @transform_0(%arg0: i32) -> (i32, i32) {
    %c0_i32 = arith.constant 0 : i32
    %c0_i32_0 = arith.constant 0 : i32
    return %arg0, %c0_i32 : i32, i32
  }
  func.func @transform_1(%arg0: i32) -> (i32, i32) {
    %c0_i32 = arith.constant 0 : i32
    %c0_i32_0 = arith.constant 0 : i32
    return %arg0, %c0_i32 : i32, i32
  }
  func.func @transform_2(%arg0: i32) -> (i32, i32) {
    %c0_i32 = arith.constant 0 : i32
    %c0_i32_0 = arith.constant 0 : i32
    %c0_i32_1 = arith.constant 0 : i32
    return %c0_i32, %c0_i32_0 : i32, i32
  }
  func.func @transform_3(%arg0: i32) -> (i32, i32) {
    %c0_i32 = arith.constant 0 : i32
    %c0_i32_0 = arith.constant 0 : i32
    %c0_i32_1 = arith.constant 0 : i32
    return %c0_i32, %c0_i32_0 : i32, i32
  }
  func.func @transform_4(%arg0: i32) -> (i32, i32) {
    %c0_i32 = arith.constant 0 : i32
    %c0_i32_0 = arith.constant 0 : i32
    %c0_i32_1 = arith.constant 0 : i32
    return %c0_i32, %c0_i32_0 : i32, i32
  }
  func.func @transform_5(%arg0: i32) -> (i32, i32) {
    %c0_i32 = arith.constant 0 : i32
    %c0_i32_0 = arith.constant 0 : i32
    %c0_i32_1 = arith.constant 0 : i32
    return %c0_i32, %c0_i32_0 : i32, i32
  }
  func.func @transform_6(%arg0: i32) -> (i32, i32) {
    %c0_i32 = arith.constant 0 : i32
    %c0_i32_0 = arith.constant 0 : i32
    %c0_i32_1 = arith.constant 0 : i32
    return %c0_i32, %c0_i32_0 : i32, i32
  }
  func.func @transform_7(%arg0: i32) -> (i32, i32) {
    %c0_i32 = arith.constant 0 : i32
    %c0_i32_0 = arith.constant 0 : i32
    %c0_i32_1 = arith.constant 0 : i32
    return %c0_i32, %c0_i32_0 : i32, i32
  }
  func.func @transform_8(%arg0: i32) -> (i32, i32) {
    %c0_i32 = arith.constant 0 : i32
    %c0_i32_0 = arith.constant 0 : i32
    %c0_i32_1 = arith.constant 0 : i32
    return %c0_i32, %c0_i32_0 : i32, i32
  }
  func.func @transform_9(%arg0: i32) -> (i32, i32) {
    %c0_i32 = arith.constant 0 : i32
    %c0_i32_0 = arith.constant 0 : i32
    %c0_i32_1 = arith.constant 0 : i32
    return %c0_i32, %c0_i32_0 : i32, i32
  }
  func.func @transform_10(%arg0: i32) -> (i32, i32) {
    %c0_i32 = arith.constant 0 : i32
    %c0_i32_0 = arith.constant 0 : i32
    return %arg0, %c0_i32 : i32, i32
  }
  func.func @transform_11(%arg0: i32) -> (i32, i32) {
    %c0_i32 = arith.constant 0 : i32
    %c0_i32_0 = arith.constant 0 : i32
    return %arg0, %c0_i32 : i32, i32
  }
  func.func @transform_12(%arg0: i32) -> (i32, i32) {
    %c0_i32 = arith.constant 0 : i32
    %c0_i32_0 = arith.constant 0 : i32
    return %arg0, %c0_i32 : i32, i32
  }
}

</mosaic_0001>

<bundles_post_ra>
// kernel: tpu_custom_call.1
= control target key start
LH: loop header
LB: loop body
LE: loop exit
PB: predicated region body
PF: predicated region fallthrough
CT: control target
= control target key end

     0   :  { %s2684_s0 = inlined_call_operand.hbm [shape: f32[64,128], index: 0, kind: input, shape index: {}]   ;;  %s2685_s1 = inlined_call_operand.hbm [shape: f32[64,128], index: 1, kind: input, shape index: {}]   ;;  %s2686_s2 = inlined_call_operand.hbm [shape: f32[128,128], index: 2, kind: input, shape index: {}]   ;;  %s2687_s3 = inlined_call_operand.vmem [shape: f32[1,128], index: 3, kind: input, shape index: {}]   ;;  %s2688_s4 = inlined_call_operand.hbm [shape: f32[128,256], index: 4, kind: input, shape index: {}]   ;;  %s2689_s5 = inlined_call_operand.vmem [shape: f32[1,256], index: 5, kind: input, shape index: {}]   ;;  %s2690_s6 = inlined_call_operand.hbm [shape: f32[128,128], index: 6, kind: input, shape index: {}]   ;;  %s2691_s7 = inlined_call_operand.vmem [shape: f32[1,128], index: 7, kind: input, shape index: {}]   ;;  %s2692_s8 = inlined_call_operand.hbm [shape: f32[128,256], index: 8, kind: input, shape index: {}]   ;;  %s2693_s9 = inlined_call_operand.vmem [shape: f32[1,256], index: 9, kind: input, shape index: {}]   ;;  %s2694_s10 = inlined_call_operand.hbm [shape: f32[64,128], index: 10, kind: output, shape index: {0}]   ;;  %s2695_s11 = inlined_call_operand.hbm [shape: f32[64,128], index: 11, kind: output, shape index: {1}]   ;;  %s2696_s12 = inlined_call_operand.hbm [shape: f32[64,128], index: 12, kind: output, shape index: {2}]  }
   0x1   :  { %2711 = sst [smem:[#allocation29_spill]] %s2686_s2 }
   0x2   :  { %2712 = sst [smem:[#allocation30_spill]] %s2688_s4 }
   0x3   :  { %2713 = sst [smem:[#allocation31_spill]] %s2690_s6 }
   0x4   :  { %2714 = sst [smem:[#allocation32_spill]] %s2692_s8 }
   0x5   :  { %2715 = sst [smem:[#allocation33_spill]] %s2696_s12 }
   0x6   :  { %18 = vsyncpa [#allocation3], 0 }
   0x7   :  { %20 = vsyncpa [#allocation3 + $0x1], 0 }
   0x8   :  { %21 = vsyncpa [#allocation6], 0 }
   0x9   :  { %23 = vsyncpa [#allocation6 + $0x1], 0 }
   0xa   :  { %24 = vsyncpa [#allocation9], 0 }
   0xb   :  { %25 = vsyncpa [#allocation12], 0 }
   0xc   :  { %26 = vsyncpa [#allocation4], 0 }
   0xd   :  { %28 = vsyncpa [#allocation4 + $0x1], 0 }
   0xe   :  { %29 = vsyncpa [#allocation15], 0 }
   0xf   :  { %31 = vsyncpa [#allocation15 + $0x1], 0  ;;  %s2198_s21 = smov 0   ;;  %s2200_s22 = smov 0  }
  0x10   :  { %s2202_s23 = smov 0   ;;  %s2204_s24 = smov 0  }
  0x11 LB: > { %2716 = sst [smem:[#allocation24_spill]] %s2098_s21  ;;  %s2219_s25 = sadd.s32 4294967295, %s2110_s24   ;;  %s2110_s24 = sphi %s2204_s24, %s2748_s24   ;;  %s2106_s23 = sphi %s2202_s23, %s2750_s23   ;;  %s2102_s22 = sphi %s2200_s22, %s2752_s22   ;;  %s2098_s21 = sphi %s2198_s21, %s2751_s21  }
  0x12   : > { %2717 = sst [smem:[#allocation25_spill]] %s2106_s23  ;;  %s2697_s26 = sadd.s32 4294967294, %s2110_s24  }
  0x13   : > { %p57_p0 = scmp.ne.s32.totalorder %s2102_s22, %s2098_s21  ;;  %p2702_p1 = scmp.eq.s32.totalorder %s2219_s25, 0 }
  0x14   : > { %p281_p3 = scmp.eq.s32.totalorder %s2697_s26, 1  ;;  %p1499_p5 = scmp.ge.s32.totalorder %s2110_s24, 1 }
  0x15   : > { %p2230_p4 = por %p2702_p1, %p57_p0  ;;  %p340_p7 = scmp.lt.s32.totalorder %s2110_s24, 3 }
  0x16   : > { %p2235_p6 = por %p281_p3, %p57_p0  ;;  %s2112_s30 = smov [#allocation7]  }
  0x17   : > { %s2718_s27 = scalar_select %p2230_p4, 1, 0 }
  0x18   : > { %s2719_s28 = scalar_select %p2235_p6, 1, 0 }
  0x19   : > { %p2240_p8 = pnand %p1499_p5, %p340_p7  ;;  %s352_s13 = sshll.u32 %s2112_s30, 4  ;;  %s353_s13 = int_to_ptr.vmem [resolvable:$true] %s352_s13 }
  0x1a   : > { %2720 = sst [smem:[#allocation26_spill]] %s2719_s28  ;;  %s2113_s15 = smov [#allocation8]  }
  0x1b   : > { %p1689_p9 = pneg %p2240_p8  ;;  %s368_s16 = sshll.u32 %s2113_s15, 4  ;;  %s369_s16 = int_to_ptr.vmem [resolvable:$true] %s368_s16 }
  0x1c   : > { %s1825_s17 = scalar_lea.vmem %s353_s13, 2048  ;;  %p1833_p5 = scmp.lt.s32.totalorder %s353_s13, %s353_s13 }
  0x1d   : > { %p2249_p11 = pnand %p1689_p9, %p2702_p1  ;;  %p1826_p13 = scmp.ne.s32.totalorder %s353_s13, %s1825_s17 }
  0x1e   : > { %p1834_p7 = scmp.lt.s32.totalorder %s1825_s17, %s1825_s17 }
  0x1f   : > { %p1816_p12 = pneg %p2249_p11 }
  0x20   : > { %p1835_p10 = por %p1834_p7, %p1833_p5 }
  0x21   : > { %p1828_p0 = pnand %p1826_p13, %p1816_p12 }
  0x23   : > { %p1829_p3 = pneg %p1828_p0 }
  0x25   : > { %p1836_p9 = pnand %p1835_p10, %p1829_p3 }
  0x27   : > { %1839 = shalt.err (!%p1836_p9)
}
  0x28   : > { %s2698_s18 = smov 128   ;;  %s2700_s19 = smov 8  }
  0x29   : > { %s2723_s2 = sld [smem:[#allocation29_spill]]  ;;  %s1851_s15 = scalar_lea.vmem %s369_s16, 4096 }
  0x2a   : > { %p1852_p13 = scmp.ne.s32.totalorder %s369_s16, %s1851_s15  ;;  %p1859_p10 = scmp.lt.s32.totalorder %s369_s16, %s369_s16 }
  0x2b   : > { %p1860_p3 = scmp.lt.s32.totalorder %s1851_s15, %s1851_s15 }
  0x2c   : > { %p1854_p0 = pnand %p1852_p13, %p1816_p12 }
  0x2d   : > { %p1861_p7 = por %p1860_p3, %p1859_p10 }
  0x2e   : > { %p1855_p5 = pneg %p1854_p0 }
  0x2f   : > { %1692 = dma.hbm_to_vmem [thread:$0]  (!%p2249_p11), %s2723_s2, 2048, %s353_s13, [#allocation6], %s2698_s18, %s2698_s18, %s2700_s19  }
  0x30   : > { %p1862_p9 = pnand %p1861_p7, %p1855_p5 }
  0x32   : > { %1865 = shalt.err (!%p1862_p9)
}
  0x33   : > { %s2116_s17 = smov 256   ;;  %s2117_s26 = smov 16  }
  0x34   : > { %s2724_s4 = sld [smem:[#allocation30_spill]]  ;;  %s2118_s30 = smov [#allocation10]  }
  0x35   : > { %s384_s18 = sshll.u32 %s2118_s30, 4  ;;  %s2119_s19 = smov [#allocation11]   ;;  %s385_s18 = int_to_ptr.vmem [resolvable:$true] %s384_s18 }
  0x36   : > { %s400_s2 = sshll.u32 %s2119_s19, 4  ;;  %s1877_s15 = scalar_lea.vmem %s385_s18, 2048  ;;  %s401_s2 = int_to_ptr.vmem [resolvable:$true] %s400_s2 }
  0x37   : > { %p1878_p13 = scmp.ne.s32.totalorder %s385_s18, %s1877_s15  ;;  %p1885_p10 = scmp.lt.s32.totalorder %s385_s18, %s385_s18 }
  0x38   : > { %p1886_p3 = scmp.lt.s32.totalorder %s1877_s15, %s1877_s15 }
  0x39   : > { %p1880_p0 = pnand %p1878_p13, %p1816_p12 }
  0x3a   : > { %1695 = dma.hbm_to_vmem [thread:$0]  (!%p2249_p11), %s2724_s4, 4096, %s369_s16, [#allocation9], %s2116_s17, %s2116_s17, %s2117_s26  }
  0x3b   : > { %p1881_p5 = pneg %p1880_p0  ;;  %p1887_p7 = por %p1886_p3, %p1885_p10 }
  0x3d   : > { %p1888_p9 = pnand %p1887_p7, %p1881_p5 }
  0x3f   : > { %1891 = shalt.err (!%p1888_p9)
}
  0x40   : > { %s2725_s16 = smov 8   ;;  %s2726_s13 = smov 128  }
  0x41   : > { %s2727_s6 = sld [smem:[#allocation31_spill]]  ;;  %s1903_s30 = scalar_lea.vmem %s401_s2, 4096 }
  0x42   : > { %p1904_p1 = scmp.ne.s32.totalorder %s401_s2, %s1903_s30  ;;  %p1911_p2 = scmp.lt.s32.totalorder %s401_s2, %s401_s2 }
  0x43   : > { %p1912_p10 = scmp.lt.s32.totalorder %s1903_s30, %s1903_s30 }
  0x44   : > { %p1906_p13 = pnand %p1904_p1, %p1816_p12 }
  0x45   : > { %p1913_p5 = por %p1912_p10, %p1911_p2 }
  0x46   : > { %p1907_p0 = pneg %p1906_p13 }
  0x47   : > { %1698 = dma.hbm_to_vmem [thread:$0]  (!%p2249_p11), %s2727_s6, 2048, %s385_s18, [#allocation9], %s2726_s13, %s2726_s13, %s2725_s16  }
  0x48   : > { %p1914_p3 = pnand %p1913_p5, %p1907_p0 }
  0x4a   : > { %1917 = shalt.err (!%p1914_p3)
}
  0x4b   : > { %s2728_s8 = sld [smem:[#allocation32_spill]]  ;;  %s2300_s18 = sadd.s32 1, %s2110_s24  }
  0x4c   : > { %2729 = sst [smem:[#allocation27_spill]] %s2300_s18  ;;  %s41_s14 = ssub.s32 %s2110_s24, %s2300_s18 }
  0x4d   : > { %p42_p1 = scmp.eq.s32.totalorder %s41_s14, 0  ;;  %s44_s19 = sadd.s32 1, %s2106_s23 }
  0x4e   : > { %p51_p2 = scmp.ne.s32.totalorder %s2106_s23, %s2102_s22  ;;  %p52_p12 = scmp.eq.s32.totalorder %s2110_s24, 0 }
  0x4f   : > { %s2309_s30 = scalar_select %p42_p1, %s2106_s23, %s44_s19  }
  0x50   : > { %p53_p7 = por %p52_p12, %p51_p2  ;;  %p2731_p9 = scmp.eq.s32.totalorder %s2219_s25, 1 }
  0x51   : > { %1701 = dma.hbm_to_vmem [thread:$0]  (!%p2249_p11), %s2728_s8, 4096, %s401_s2, [#allocation12], %s2116_s17, %s2116_s17, %s2117_s26  }
  0x52   : > { %2730 = sst [smem:[#allocation28_spill]] %s2309_s30  ;;  %p2313_p13 = por %p2731_p9, %p51_p2 }
  0x53   : > { %p1723_p0 = scmp.lt.s32.totalorder %s2110_s24, 2  ;;  %s417_s20 = sand.u32 1, %s2106_s23  }
  0x54   : > { %s2732_s15 = scalar_select %p2313_p13, 1, 0 }
  0x55   : > { %s1505_s4 = sshll.u32 %s417_s20, 5  ;;  %s1542_s2 = sshll.u32 %s2110_s24, 9 }
  0x56   : > { %s2323_s6 = scalar_lea.hbm %s2684_s0, %s1542_s2  ;;  %s421_s14 = scalar_lea.vmem [#allocation2], %s1505_s4 }
  0x57   : > { %s428_s19 = sshll.u32 %s421_s14, 4  ;;  %p2327_p11 = pnand %p1723_p0, %p53_p7  ;;  %s2325_s19 = int_to_ptr.vmem [resolvable:$true] %s428_s19 }
  0x58   : > { %s2334_s18 = scalar_lea.hbm %s2685_s1, %s1542_s2  ;;  %s442_s26 = scalar_lea.vmem [#allocation5], %s1505_s4 }
  0x59   : > { %s2336_s17 = sshll.u32 %s442_s26, 4  ;;  %s2338_s28 = scalar_lea.sflag [#allocation3], %s417_s20  ;;  %s2369_s17 = int_to_ptr.vmem [resolvable:$true] %s2336_s17 }
  0x5a   : > { %s1918_s21 = scalar_lea.hbm %s2323_s6, 512  ;;  %p1920_p5 = pneg %p2327_p11 }
  0x5b   : > { %p1919_p10 = scmp.ne.s32.totalorder %s2323_s6, %s1918_s21  ;;  %s1923_s23 = scalar_lea.hbm %s2684_s0, 1024 }
  0x5c   : > { %p1924_p2 = scmp.lt.s32.totalorder %s2323_s6, %s2684_s0  ;;  %p1925_p12 = scmp.lt.s32.totalorder %s1923_s23, %s1918_s21 }
  0x5d   : > { %p1921_p3 = pnand %p1920_p5, %p1919_p10 }
  0x5e   : > { %p1926_p7 = por %p1925_p12, %p1924_p2 }
  0x5f   : > { %p1922_p1 = pneg %p1921_p3 }
  0x61   : > { %p1927_p9 = pnand %p1926_p7, %p1922_p1 }
  0x63   : > { %1930 = shalt.err (!%p1927_p9)
}
  0x64   : > { %s1931_s4 = scalar_lea.vmem %s2325_s19, 512  ;;  %s2120_s12 = smov [#allocation2]  }
  0x65   : > { %p1932_p0 = scmp.ne.s32.totalorder %s2325_s19, %s1931_s4  ;;  %s1936_s20 = sshll.u32 %s2120_s12, 4  ;;  %s1937_s20 = int_to_ptr.vmem [resolvable:$false] %s1936_s20 }
  0x66   : > { %s1938_s26 = scalar_lea.vmem %s1937_s20, 1024  ;;  %p1939_p6 = scmp.lt.s32.totalorder %s2325_s19, %s1937_s20 }
  0x67   : > { %p1934_p10 = pnand %p1932_p0, %p1920_p5  ;;  %p1940_p13 = scmp.lt.s32.totalorder %s1938_s26, %s1931_s4 }
  0x69   : > { %p1935_p3 = pneg %p1934_p10  ;;  %p1941_p4 = por %p1940_p13, %p1939_p6 }
  0x6b   : > { %p1942_p2 = pnand %p1941_p4, %p1935_p3 }
  0x6d   : > { %1945 = shalt.err (!%p1942_p2)
}
  0x6e   : > { %1705 = dma.hbm_to_vmem [thread:$0]  (!%p2327_p11), %s2323_s6, 512, %s2325_s19, %s2338_s28, %s2726_s13, %s2726_s13, %s2725_s16  }
  0x6f   : > { %s438_s21 = sand.u32 1, %s2110_s24   ;;  %s1946_s23 = scalar_lea.hbm %s2334_s18, 512 }
  0x70   : > { %s439_s14 = scalar_lea.sflag [#allocation6], %s438_s21  ;;  %p1947_p4 = scmp.ne.s32.totalorder %s2334_s18, %s1946_s23 }
  0x71   : > { %s1951_s4 = scalar_lea.hbm %s2685_s1, 1024  ;;  %p1952_p1 = scmp.lt.s32.totalorder %s2334_s18, %s2685_s1 }
  0x72   : > { %p1949_p6 = pnand %p1947_p4, %p1920_p5  ;;  %p1953_p12 = scmp.lt.s32.totalorder %s1951_s4, %s1946_s23 }
  0x74   : > { %p1950_p13 = pneg %p1949_p6  ;;  %p1954_p7 = por %p1953_p12, %p1952_p1 }
  0x76   : > { %p1955_p9 = pnand %p1954_p7, %p1950_p13 }
  0x78   : > { %1958 = shalt.err (!%p1955_p9)
}
  0x79   : > { %s1959_s6 = scalar_lea.vmem %s2369_s17, 512  ;;  %s2121_s28 = smov [#allocation5]  }
  0x7a   : > { %p1960_p0 = scmp.ne.s32.totalorder %s2369_s17, %s1959_s6  ;;  %s1964_s19 = sshll.u32 %s2121_s28, 4  ;;  %s1965_s19 = int_to_ptr.vmem [resolvable:$false] %s1964_s19 }
  0x7b   : > { %s1966_s26 = scalar_lea.vmem %s1965_s19, 1024  ;;  %p1967_p2 = scmp.lt.s32.totalorder %s2369_s17, %s1965_s19 }
  0x7c   : > { %p1962_p10 = pnand %p1960_p0, %p1920_p5  ;;  %p1968_p4 = scmp.lt.s32.totalorder %s1966_s26, %s1959_s6 }
  0x7e   : > { %p1963_p3 = pneg %p1962_p10  ;;  %p1969_p6 = por %p1968_p4, %p1967_p2 }
  0x80   : > { %p1970_p1 = pnand %p1969_p6, %p1963_p3 }
  0x82   : > { %1973 = shalt.err (!%p1970_p1)
}
  0x83   : > { %1708 = dma.hbm_to_vmem [thread:$0]  (!%p2327_p11), %s2334_s18, 512, %s2369_s17, %s439_s14, %s2726_s13, %s2726_s13, %s2725_s16  }
  0x84   : > { %461 = sbr.rel (%p2240_p8) target bundleno = 1160 (0x488), region = 60  ;;  %s2400_s21 = sand.u32 (!%p2240_p8), 1, %s2102_s22  }
  0x85   : > { %s2403_s23 = sshll.u32 (!%p2240_p8), %s2400_s21, 5  ;;  %s464_s30 = scalar_lea.sflag (!%p2240_p8), [#allocation3], %s2400_s21 }
  0x86   : > { %s2407_s8 = scalar_lea.vmem (!%p2240_p8), [#allocation2], %s2403_s23  ;;  %p2734_p5 = scmp.ne.s32.totalorder (!%p2240_p8), %s2718_s27, 0 }
  0x89   : > { %2069 = dma.done.wait (%p2734_p5), %s464_s30, 512  }
  0x8a   : > { %2071 = vsyncadd (%p2734_p5), %s464_s30, 4294966784  ;;  %s472_s29 = sand.u32 1, %s2219_s25   ;;  %s2417_s13 = scalar_lea.vmem [#allocation5], %s2403_s23 }
  0x8b   : > { %s473_s16 = scalar_lea.sflag [#allocation6], %s472_s29 }
  0x8c   : > { %2073 = dma.done.wait (%p2734_p5), %s473_s16, 512  }
  0x8d   : > { %2075 = vsyncadd (%p2734_p5), %s473_s16, 4294966784  ;;  %p2735_p8 = scmp.eq.s32.totalorder %s2219_s25, 0 }
  0x8f   : > { %2077 = dma.done.wait (%p2735_p8), [#allocation6], 2048   ;;  %p2736_p11 = pmov %p2735_p8 }
  0x90   : > { %p2737_p13 = pmov %p2735_p8 }
  0x91   : > { %2079 = vsyncadd (%p2736_p11), [#allocation6], 4294965248 }
  0x92   : > { %2081 = dma.done.wait (%p2737_p13), [#allocation9], 6144   ;;  %p2738_p12 = pmov %p2735_p8 }
  0x93   : > { %p2739_p7 = pmov %p2735_p8 }
  0x94   : > { %2083 = vsyncadd (%p2738_p12), [#allocation9], 4294961152 }
  0x95   : > { %2085 = dma.done.wait (%p2739_p7), [#allocation12], 4096   ;;  %p2740_p9 = pmov %p2739_p7 }
  0x96   : > { %v572_v0 = vld [vmem:[#allocation7 + $0x78] sm:$0xff]  ;;  %v571_v1 = vld [vmem:[#allocation7 + $0x70] sm:$0xff]  ;;  %v570_v2 = vld [vmem:[#allocation7 + $0x68] sm:$0xff]  ;;  %s2462_s12 = scalar_lea.vmem [#allocation13], %s2403_s23  ;;  %s2474_s28 = scalar_lea.vmem [#allocation14], %s2403_s23 }
  0x97   : > { %2087 = vsyncadd (%p2740_p9), [#allocation12], 4294963200  ;;  %1587 = vmatprep.subr.mxu0 %v572_v0  ;;  %v569_v3 = vld [vmem:[#allocation7 + $0x60] sm:$0xff]  ;;  %v568_v5 = vld [vmem:[#allocation7 + $0x58] sm:$0xff]  ;;  %s2123_s19 = smov 1   ;;  %s2124_s26 = smov 2  }
  0x98   : > { %1588 = vmatpush3.msra.mxu0 %v572_v0  ;;  %v553_v4 = vld [vmem:[%s2407_s8] sm:$0xff]  ;;  %v567_v6 = vld [vmem:[#allocation7 + $0x50] sm:$0xff]  ;;  %v566_v7 = vld [vmem:[#allocation7 + $0x48] sm:$0xff]  ;;  %s2127_s30 = smov 127   ;;  %s1287_s16 = sshll.u32 %s2474_s28, 4  ;;  %s2544_s16 = int_to_ptr.vmem [resolvable:$true] %s1287_s16 }
  0x99   : > { %1589 = vmatprep.subr.mxu0 %v571_v1  ;;  %1619 = vmatprep.mubr.f32.mxu0 %v553_v4  ;;  %v565_v8 = vld [vmem:[#allocation7 + $0x40] sm:$0xff]  ;;  %v700_v9 = vld [vmem:[#allocation8 + $0xf8] sm:$0xff]  ;;  %v699_v10 = vld [vmem:[#allocation8 + $0xf0] sm:$0xff]  ;;  %s2559_s14 = scalar_lea.sflag [#allocation15], %s472_s29  ;;  %s1974_s2 = scalar_lea.vmem %s2544_s16, 512 }
  0x9a   : > { %1590 = vmatpush3.msra.mxu0 %v571_v1  ;;  %v564_v11 = vld [vmem:[#allocation7 + $0x38] sm:$0xff]  ;;  %713 = vmatprep.subr.mxu1 %v700_v9  ;;  %v698_v12 = vld [vmem:[#allocation8 + $0xe8] sm:$0xff]  ;;  %v697_v13 = vld [vmem:[#allocation8 + $0xe0] sm:$0xff]  ;;  %p1975_p0 = scmp.ne.s32.totalorder %s2544_s16, %s1974_s2  ;;  %p2741_p10 = scmp.ne.s32.totalorder %s2732_s15, 0 }
  0x9b   : > { %1591 = vmatprep.subr.mxu0 %v570_v2  ;;  %714 = vmatpush1.msra.mxu1 %v699_v10  ;;  %v696_v14 = vld [vmem:[#allocation8 + $0xd8] sm:$0xff]  ;;  %v563_v15 = vld [vmem:[#allocation7 + $0x30] sm:$0xff]  ;;  %v694_v17 = vld [vmem:[#allocation8 + $0xc8] sm:$0xff]  ;;  %s2128_s4 = smov [#allocation14]  }
  0x9c   : > { %1592 = vmatpush3.msra.mxu0 %v570_v2  ;;  %715 = vmatprep.subr.mxu1 %v698_v12  ;;  %v695_v16 = vld [vmem:[#allocation8 + $0xd0] sm:$0xff]  ;;  %v562_v18 = vld [vmem:[#allocation7 + $0x28] sm:$0xff]  ;;  %v693_v19 = vld [vmem:[#allocation8 + $0xc0] sm:$0xff]  ;;  %p1976_p3 = pnand %p1975_p0, %p2741_p10 }
  0x9d   : > { %1593 = vmatprep.subr.mxu0 %v569_v3  ;;  %716 = vmatpush1.msra.mxu1 %v697_v13  ;;  %v692_v20 = vld [vmem:[#allocation8 + $0xb8] sm:$0xff]  ;;  %v561_v21 = vld [vmem:[#allocation7 + $0x20] sm:$0xff]  ;;  %v691_v22 = vld [vmem:[#allocation8 + $0xb0] sm:$0xff] }
  0x9e   : > { %1594 = vmatpush3.msra.mxu0 %v569_v3  ;;  %717 = vmatprep.subr.mxu1 %v696_v14  ;;  %v690_v23 = vld [vmem:[#allocation8 + $0xa8] sm:$0xff]  ;;  %v560_v24 = vld [vmem:[#allocation7 + $0x18] sm:$0xff]  ;;  %v689_v25 = vld [vmem:[#allocation8 + $0xa0] sm:$0xff]  ;;  %p1977_p2 = pneg %p1976_p3 }
  0x9f   : > { %1595 = vmatprep.subr.mxu0 %v568_v5  ;;  %718 = vmatpush1.msra.mxu1 %v695_v16  ;;  %v688_v26 = vld [vmem:[#allocation8 + $0x98] sm:$0xff]  ;;  %v559_v27 = vld [vmem:[#allocation7 + $0x10] sm:$0xff]  ;;  %v686_v29 = vld [vmem:[#allocation8 + $0x88] sm:$0xff] }
  0xa0   : > { %1596 = vmatpush3.msra.mxu0 %v568_v5  ;;  %719 = vmatprep.subr.mxu1 %v694_v17  ;;  %v687_v28 = vld [vmem:[#allocation8 + $0x90] sm:$0xff]  ;;  %v558_v30 = vld [vmem:[#allocation7 + $0x8] sm:$0xff]  ;;  %v685_v31 = vld [vmem:[#allocation8 + $0x80] sm:$0xff] }
  0xa1   : > { %1597 = vmatprep.subr.mxu0 %v567_v6  ;;  %720 = vmatpush1.msra.mxu1 %v693_v19  ;;  %v684_v32 = vld [vmem:[#allocation8 + $0x78] sm:$0xff]  ;;  %v557_v33 = vld [vmem:[#allocation7] sm:$0xff]  ;;  %v683_v34 = vld [vmem:[#allocation8 + $0x70] sm:$0xff] }
  0xa2   : > { %1598 = vmatpush3.msra.mxu0 %v567_v6  ;;  %721 = vmatprep.subr.mxu1 %v692_v20  ;;  %v682_v35 = vld [vmem:[#allocation8 + $0x68] sm:$0xff]  ;;  %v825_v37 = vld [vmem:[#allocation10 + $0x78] sm:$0xff]  ;;  %v555_v38 = vld [vmem:[%s2407_s8 + $0x10] sm:$0xff] }
  0xa3   : > { %1599 = vmatprep.subr.mxu0 %v566_v7  ;;  %722 = vmatpush1.msra.mxu1 %v691_v22  ;;  %v554_v36 = vld [vmem:[%s2407_s8 + $0x8] sm:$0xff]  ;;  %v824_v39 = vld [vmem:[#allocation10 + $0x70] sm:$0xff]  ;;  %v681_v40 = vld [vmem:[#allocation8 + $0x60] sm:$0xff] }
  0xa4   : > { %1600 = vmatpush3.msra.mxu0 %v566_v7  ;;  %723 = vmatprep.subr.mxu1 %v690_v23  ;;  %v680_v41 = vld [vmem:[#allocation8 + $0x58] sm:$0xff]  ;;  %v823_v42 = vld [vmem:[#allocation10 + $0x68] sm:$0xff]  ;;  %v806_v44 = vld [vmem:[%s2417_s13] sm:$0xff] }
  0xa5   : > { %1601 = vmatprep.subr.mxu0 %v565_v8  ;;  %724 = vmatpush1.msra.mxu1 %v689_v25  ;;  %v556_v43 = vld [vmem:[%s2407_s8 + $0x18] sm:$0xff]  ;;  %v822_v45 = vld [vmem:[#allocation10 + $0x60] sm:$0xff]  ;;  %v679_v46 = vld [vmem:[#allocation8 + $0x50] sm:$0xff]  ;;  %s1271_s8 = sshll.u32 %s2462_s12, 4  ;;  %s2542_s8 = int_to_ptr.vmem [resolvable:$true] %s1271_s8 }
  0xa6   : > { %1602 = vmatpush3.msra.mxu0 %v565_v8  ;;  %725 = vmatprep.subr.mxu1 %v688_v26  ;;  %v678_v47 = vld [vmem:[#allocation8 + $0x48] sm:$0xff]  ;;  %v821_v48 = vld [vmem:[#allocation10 + $0x58] sm:$0xff]  ;;  %v677_v49 = vld [vmem:[#allocation8 + $0x40] sm:$0xff]  ;;  %v2122_v8 = vmov 0.0  }
  0xa7   : > { %1603 = vmatprep.subr.mxu0 %v564_v11  ;;  %726 = vmatpush1.msra.mxu1 %v687_v28  ;;  %v676_v50 = vld [vmem:[#allocation8 + $0x38] sm:$0xff]  ;;  %v820_v51 = vld [vmem:[#allocation10 + $0x50] sm:$0xff]  ;;  %v819_v52 = vld [vmem:[#allocation10 + $0x48] sm:$0xff] }
  0xa8   : > { %1604 = vmatpush3.msra.mxu0 %v564_v11  ;;  %727 = vmatprep.subr.mxu1 %v686_v29  ;;  %v818_v53 = vld [vmem:[#allocation10 + $0x40] sm:$0xff]  ;;  %v817_v54 = vld [vmem:[#allocation10 + $0x38] sm:$0xff]  ;;  %v816_v55 = vld [vmem:[#allocation10 + $0x30] sm:$0xff] }
  0xa9   : > { %1605 = vmatprep.subr.mxu0 %v563_v15  ;;  %728 = vmatpush1.msra.mxu1 %v685_v31  ;;  %v815_v56 = vld [vmem:[#allocation10 + $0x28] sm:$0xff]  ;;  %v814_v57 = vld [vmem:[#allocation10 + $0x20] sm:$0xff]  ;;  %v813_v58 = vld [vmem:[#allocation10 + $0x18] sm:$0xff] }
  0xaa   : > { %1606 = vmatpush3.msra.mxu0 %v563_v15  ;;  %729 = vmatprep.subr.mxu1 %v684_v32  ;;  %v812_v59 = vld [vmem:[#allocation10 + $0x10] sm:$0xff]  ;;  %v811_v60 = vld [vmem:[#allocation10 + $0x8] sm:$0xff]  ;;  %v810_v61 = vld [vmem:[#allocation10] sm:$0xff] }
  0xab   : > { %1607 = vmatprep.subr.mxu0 %v562_v18  ;;  %730 = vmatpush1.msra.mxu1 %v683_v34  ;;  %v807_v62 = vld [vmem:[%s2417_s13 + $0x8] sm:$0xff]  ;;  %v808_v63 = vld [vmem:[%s2417_s13 + $0x10] sm:$0xff]  ;;  %v809_v0 = vld [vmem:[%s2417_s13 + $0x18] sm:$0xff]  ;;  %s2548_s13 = sshll.u32 %s2219_s25, 9 }
  0xac   : > { %1608 = vmatpush3.msra.mxu0 %v562_v18  ;;  %731 = vmatprep.subr.mxu1 %v682_v35  ;;  %v675_v1 = vld [vmem:[#allocation8 + $0x30] sm:$0xff]  ;;  %v674_v2 = vld [vmem:[#allocation8 + $0x28] sm:$0xff]  ;;  %v673_v3 = vld [vmem:[#allocation8 + $0x20] sm:$0xff]  ;;  %s2555_s17 = scalar_lea.hbm %s2695_s11, %s2548_s13 }
  0xad   : > { %1609 = vmatprep.subr.mxu0 %v561_v21  ;;  %732 = vmatpush1.msra.mxu1 %v681_v40  ;;  %v672_v4 = vld [vmem:[#allocation8 + $0x18] sm:$0xff]  ;;  %v671_v5 = vld [vmem:[#allocation8 + $0x10] sm:$0xff]  ;;  %v670_v6 = vld [vmem:[#allocation8 + $0x8] sm:$0xff] }
  0xae   : > { %1610 = vmatpush3.msra.mxu0 %v561_v21  ;;  %733 = vmatprep.subr.mxu1 %v680_v41  ;;  %v669_v7 = vld [vmem:[#allocation8] sm:$0xff]  ;;  %v953_v9 = vld [vmem:[#allocation11 + $0xf8] sm:$0xff]  ;;  %v952_v17 = vld [vmem:[#allocation11 + $0xf0] sm:$0xff] }
  0xaf   : > { %1611 = vmatprep.subr.mxu0 %v560_v24  ;;  %734 = vmatpush1.msra.mxu1 %v679_v46  ;;  %v1521_v11 = vld [vmem:[%s2687_s3] ss:$0 sm:$0xff]  ;;  %v951_v18 = vld [vmem:[#allocation11 + $0xe8] sm:$0xff]  ;;  %v949_v22 = vld [vmem:[#allocation11 + $0xd8] sm:$0xff] }
  0xb0   : > { %1612 = vmatpush3.msra.mxu0 %v560_v24  ;;  %735 = vmatprep.subr.mxu1 %v678_v47  ;;  %v950_v20 = vld [vmem:[#allocation11 + $0xe0] sm:$0xff]  ;;  %v948_v24 = vld [vmem:[#allocation11 + $0xd0] sm:$0xff]  ;;  %v947_v25 = vld [vmem:[#allocation11 + $0xc8] sm:$0xff] }
  0xb1   : > { %1613 = vmatprep.subr.mxu0 %v559_v27  ;;  %736 = vmatpush1.msra.mxu1 %v677_v49  ;;  %v946_v26 = vld [vmem:[#allocation11 + $0xc0] sm:$0xff]  ;;  %v945_v29 = vld [vmem:[#allocation11 + $0xb8] sm:$0xff]  ;;  %v943_v31 = vld [vmem:[#allocation11 + $0xa8] sm:$0xff] }
  0xb2   : > { %1614 = vmatpush3.msra.mxu0 %v559_v27  ;;  %737 = vmatprep.subr.mxu1 %v676_v50  ;;  %v941_v34 = vld [vmem:[#allocation11 + $0x98] sm:$0xff]  ;;  %v940_v35 = vld [vmem:[#allocation11 + $0x90] sm:$0xff]  ;;  %v935_v40 = vld [vmem:[#allocation11 + $0x68] sm:$0xff] }
  0xb3   : > { %1615 = vmatprep.subr.mxu0 %v558_v30  ;;  %738 = vmatpush1.msra.mxu1 %v675_v1  ;;  %v934_v41 = vld [vmem:[#allocation11 + $0x60] sm:$0xff]  ;;  %v929_v46 = vld [vmem:[#allocation11 + $0x38] sm:$0xff]  ;;  %v928_v47 = vld [vmem:[#allocation11 + $0x30] sm:$0xff] }
  0xb4   : > { %1616 = vmatpush3.msra.mxu0 %v558_v30  ;;  %739 = vmatprep.subr.mxu1 %v674_v2  ;;  %v944_v30 = vld [vmem:[#allocation11 + $0xb0] sm:$0xff]  ;;  %v926_v49 = vld [vmem:[#allocation11 + $0x20] sm:$0xff] }
  0xb5   : > { %1617 = vmatprep.subr.mxu0 %v557_v33  ;;  %740 = vmatpush1.msra.mxu1 %v673_v3  ;;  %v703_v3 = vlaneseq }
  0xb6   : > { %1618 = vmatpush3.msra.mxu0 %v557_v33  ;;  %741 = vmatprep.subr.mxu1 %v672_v4  ;;  %v942_v33 = vld [vmem:[#allocation11 + $0xa0] sm:$0xff] }
  0xb7   : > { %1620 = vmatmul.mubr.f32.vlgmr.msra.gmra.mxu0 %v554_v36  ;;  %1625 = vmatprep.subr.mxu0 %v825_v37  ;;  %v939_v36 = vld [vmem:[#allocation11 + $0x88] sm:$0xff]  ;;  %v704_v4 = vshrl.u32 %v703_v3, 7 }
  0xb8   : > { %1626 = vmatpush3.msra.mxu0 %v825_v37  ;;  %1622 = vmatprep.mubr.f32.mxu0 %v555_v38  ;;  %v938_v37 = vld [vmem:[#allocation11 + $0x80] sm:$0xff]  ;;  %v937_v38 = vld [vmem:[#allocation11 + $0x78] sm:$0xff] }
  0xb9   : > { %1627 = vmatprep.subr.mxu0 %v824_v39  ;;  %742 = vmatpush1.msra.mxu1 %v671_v5  ;;  %v705_v5 = vsub.s32 0, %v704_v4 }
  0xba   : > { %1628 = vmatpush3.msra.mxu0 %v824_v39  ;;  %743 = vmatprep.subr.mxu1 %v670_v6  ;;  %v936_v39 = vld [vmem:[#allocation11 + $0x70] sm:$0xff]  ;;  %v701_v6 = vld [vmem:[%s2689_s5] sm:$0x3] }
  0xbb   : > { %1629 = vmatprep.subr.mxu0 %v823_v42  ;;  %1623 = vmatmul.mubr.f32.gmra.mxu0 %v556_v43  ;;  %v932_v43 = vld [vmem:[#allocation11 + $0x50] sm:$0xff] }
  0xbc   : > { %1630 = vmatpush3.msra.mxu0 %v823_v42  ;;  %1657 = vmatprep.mubr.f32.mxu0 %v806_v44  ;;  %v933_v42 = vld [vmem:[#allocation11 + $0x58] sm:$0xff]  ;;  %v931_v44 = vld [vmem:[#allocation11 + $0x48] sm:$0xff] }
  0xbd   : > { %1631 = vmatprep.subr.mxu0 %v822_v45  ;;  %744 = vmatpush1.msra.mxu1 %v669_v7  ;;  %v706_v7 = vrot.slane %v701_v6, %v705_v5 }
  0xbe   : > { %1632 = vmatpush3.msra.mxu0 %v822_v45  ;;  %777 = vmatprep.mubr.f32.mxu1 %v2122_v8  ;;  %v930_v45 = vld [vmem:[#allocation11 + $0x40] sm:$0xff] }
  0xbf   : > { %1633 = vmatprep.subr.mxu0 %v821_v48  ;;  %966 = vmatprep.subr.mxu1 %v953_v9 }
  0xc0   : > { %1634 = vmatpush3.msra.mxu0 %v821_v48  ;;  %v927_v48 = vld [vmem:[#allocation11 + $0x28] sm:$0xff] }
  0xc1   : > { %1635 = vmatprep.subr.mxu0 %v820_v51 }
  0xc2   : > { %1636 = vmatpush3.msra.mxu0 %v820_v51  ;;  %v925_v51 = vld [vmem:[#allocation11 + $0x18] sm:$0xff] }
  0xc3   : > { %1637 = vmatprep.subr.mxu0 %v819_v52 }
  0xc4   : > { %1638 = vmatpush3.msra.mxu0 %v819_v52  ;;  %v924_v52 = vld [vmem:[#allocation11 + $0x10] sm:$0xff] }
  0xc5   : > { %1639 = vmatprep.subr.mxu0 %v818_v53 }
  0xc6   : > { %1640 = vmatpush3.msra.mxu0 %v818_v53  ;;  %v1522_v53 = vld [vmem:[%s2691_s7] ss:$0 sm:$0xff] }
  0xc7   : > { %1641 = vmatprep.subr.mxu0 %v817_v54 }
  0xc8   : > { %1642 = vmatpush3.msra.mxu0 %v817_v54 }
  0xc9   : > { %1643 = vmatprep.subr.mxu0 %v816_v55 }
  0xca   : > { %1644 = vmatpush3.msra.mxu0 %v816_v55  ;;  %v923_v55 = vld [vmem:[#allocation11 + $0x8] sm:$0xff] }
  0xcb   : > { %1645 = vmatprep.subr.mxu0 %v815_v56 }
  0xcc   : > { %1646 = vmatpush3.msra.mxu0 %v815_v56 }
  0xcd   : > { %1647 = vmatprep.subr.mxu0 %v814_v57 }
  0xce   : > { %1648 = vmatpush3.msra.mxu0 %v814_v57  ;;  %v922_v57 = vld [vmem:[#allocation11] sm:$0xff] }
  0xcf   : > { %1649 = vmatprep.subr.mxu0 %v813_v58 }
  0xd0   : > { %1650 = vmatpush3.msra.mxu0 %v813_v58 }
  0xd1   : > { %1651 = vmatprep.subr.mxu0 %v812_v59 }
  0xd2   : > { %1652 = vmatpush3.msra.mxu0 %v812_v59 }
  0xd3   : > { %1653 = vmatprep.subr.mxu0 %v811_v60 }
  0xd4   : > { %1654 = vmatpush3.msra.mxu0 %v811_v60 }
  0xd5   : > { %1655 = vmatprep.subr.mxu0 %v810_v61 }
  0xd6   : > { %1656 = vmatpush3.msra.mxu0 %v810_v61 }
  0xd7   : > { %1658 = vmatmul.mubr.f32.vlgmr.msra.gmra.mxu0 %v807_v62 }
  0xd8   : > { %1660 = vmatprep.mubr.f32.mxu0 %v808_v63 }
  0xdb   : > { %1661 = vmatmul.mubr.f32.gmra.mxu0 %v809_v0 }
 0x177   : > { %v1621_v10 = vpop.f32.mrf.mxu0 }
 0x178   : > { %v652_v15 = vadd.f32 %v1621_v10, %v1521_v11 }
 0x179   : > { %v646_v12 = vpop.f32.mrf.mxu0 }
 0x17a   : > { %v647_v13 = vadd.f32 %v1521_v11, %v646_v12  ;;  %v666_v23 = vmax.f32 %v652_v15, 0.0 }
 0x17b   : > { %v1624_v14 = vpop.f32.mrf.mxu0 }
 0x17c   : > { %v665_v16 = vmax.f32 %v647_v13, 0.0  ;;  %v662_v27 = vadd.f32 %v1624_v14, %v1521_v11 }
 0x17d   : > { %v656_v19 = vpop.f32.mrf.mxu0 }
 0x17e   : > { %778 = vmatmul.mubr.f32.vlgmr.msra.gmra.mxu1 %v665_v16  ;;  %v657_v21 = vadd.f32 %v1521_v11, %v656_v19  ;;  %v668_v32 = vmax.f32 %v662_v27, 0.0  ;;  %v954_v19 = vld [vmem:[%s2693_s9] sm:$0x3] }
 0x17f   : > { %967 = vmatpush1.msra.mxu1 %v952_v17  ;;  %783 = vmatprep.mubr.f32.mxu1 %v2122_v8 }
 0x180   : > { %968 = vmatprep.subr.mxu1 %v951_v18  ;;  %v667_v28 = vmax.f32 %v657_v21, 0.0  ;;  %v959_v21 = vrot.slane %v954_v19, %v705_v5 }
 0x181   : > { %969 = vmatpush1.msra.mxu1 %v950_v20  ;;  %v709_v20 = vsub.s32 1, %v704_v4 }
 0x182   : > { %784 = vmatmul.mubr.f32.gmra.mxu1 %v666_v23  ;;  %970 = vmatprep.subr.mxu1 %v949_v22 }
 0x183   : > { %971 = vmatpush1.msra.mxu1 %v948_v24  ;;  %789 = vmatprep.mubr.f32.mxu1 %v2122_v8  ;;  %v710_v23 = vrot.slane %v701_v6, %v709_v20  ;;  %v963_v24 = vrot.slane %v954_v19, %v709_v20 }
 0x184   : > { %972 = vmatprep.subr.mxu1 %v947_v25 }
 0x185   : > { %973 = vmatpush1.msra.mxu1 %v946_v26 }
 0x186   : > { %974 = vmatprep.subr.mxu1 %v945_v29  ;;  %790 = vmatmul.mubr.f32.gmra.mxu1 %v667_v28 }
 0x187   : > { %975 = vmatpush1.msra.mxu1 %v944_v30  ;;  %795 = vmatprep.mubr.f32.mxu1 %v2122_v8 }
 0x188   : > { %976 = vmatprep.subr.mxu1 %v943_v31 }
 0x189   : > { %977 = vmatpush1.msra.mxu1 %v942_v33 }
 0x18a   : > { %978 = vmatprep.subr.mxu1 %v941_v34  ;;  %796 = vmatmul.mubr.f32.gmra.mxu1 %v668_v32 }
 0x18b   : > { %979 = vmatpush1.msra.mxu1 %v940_v35  ;;  %1030 = vmatprep.mubr.f32.mxu1 %v2122_v8 }
 0x18c   : > { %980 = vmatprep.subr.mxu1 %v939_v36 }
 0x18d   : > { %981 = vmatpush1.msra.mxu1 %v938_v37 }
 0x18e   : > { %982 = vmatprep.subr.mxu1 %v937_v38 }
 0x18f   : > { %983 = vmatpush1.msra.mxu1 %v936_v39 }
 0x190   : > { %984 = vmatprep.subr.mxu1 %v935_v40 }
 0x191   : > { %985 = vmatpush1.msra.mxu1 %v934_v41 }
 0x192   : > { %986 = vmatprep.subr.mxu1 %v933_v42 }
 0x193   : > { %987 = vmatpush1.msra.mxu1 %v932_v43 }
 0x194   : > { %988 = vmatprep.subr.mxu1 %v931_v44 }
 0x195   : > { %989 = vmatpush1.msra.mxu1 %v930_v45 }
 0x196   : > { %990 = vmatprep.subr.mxu1 %v929_v46 }
 0x197   : > { %v1659_v50 = vpop.f32.mrf.mxu0  ;;  %991 = vmatpush1.msra.mxu1 %v928_v47 }
 0x198   : > { %992 = vmatprep.subr.mxu1 %v927_v48  ;;  %v905_v59 = vadd.f32 %v1659_v50, %v1522_v53 }
 0x199   : > { %v899_v54 = vpop.f32.mrf.mxu0  ;;  %993 = vmatpush1.msra.mxu1 %v926_v49 }
 0x19a   : > { %v900_v56 = vadd.f32 %v1522_v53, %v899_v54  ;;  %994 = vmatprep.subr.mxu1 %v925_v51  ;;  %v919_v62 = vmax.f32 %v905_v59, 0.0 }
 0x19b   : > { %995 = vmatpush1.msra.mxu1 %v924_v52  ;;  %v1662_v58 = vpop.f32.mrf.mxu0 }
 0x19c   : > { %v918_v60 = vmax.f32 %v900_v56, 0.0  ;;  %996 = vmatprep.subr.mxu1 %v923_v55  ;;  %v915_v0 = vadd.f32 %v1662_v58, %v1522_v53 }
 0x19d   : > { %997 = vmatpush1.msra.mxu1 %v922_v57  ;;  %v909_v61 = vpop.f32.mrf.mxu0 }
 0x19e   : > { %1031 = vmatmul.mubr.f32.vlgmr.msra.gmra.mxu1 %v918_v60  ;;  %v910_v63 = vadd.f32 %v1522_v53, %v909_v61  ;;  %v921_v2 = vmax.f32 %v915_v0, 0.0 }
 0x19f   : > { %1036 = vmatprep.mubr.f32.mxu1 %v2122_v8 }
 0x1a0   : > { %v920_v1 = vmax.f32 %v910_v63, 0.0 }
 0x1a2   : > { %1037 = vmatmul.mubr.f32.gmra.mxu1 %v919_v62 }
 0x1a3   : > { %1042 = vmatprep.mubr.f32.mxu1 %v2122_v8 }
 0x1a6   : > { %1043 = vmatmul.mubr.f32.gmra.mxu1 %v920_v1 }
 0x1a7   : > { %1048 = vmatprep.mubr.f32.mxu1 %v2122_v8 }
 0x1aa   : > { %1049 = vmatmul.mubr.f32.gmra.mxu1 %v921_v2 }
 0x23e   : > { %v779_v9 = vpop.f32.mrf.mxu1 }
 0x23f   : > { %v780_v10 = vadd.f32 %v779_v9, %v706_v7 }
 0x240   : > { %v781_v11 = vpop.f32.mrf.mxu1 }
 0x241   : > { %802 = vst [vmem:[%s2462_s12] sm:$0xff] %v780_v10  ;;  %v2471_v28 = vadd.f32 %v781_v11, %v710_v23 }
 0x242   : > { %v785_v8 = vpop.f32.mrf.mxu1 }
 0x243   : > { %v786_v12 = vadd.f32 %v785_v8, %v706_v7 }
 0x244   : > { %v787_v13 = vpop.f32.mrf.mxu1 }
 0x245   : > { %803 = vst [vmem:[%s2462_s12 + $0x8] sm:$0xff] %v786_v12  ;;  %v2482_v35 = vadd.f32 %v787_v13, %v710_v23 }
 0x246   : > { %v791_v14 = vpop.f32.mrf.mxu1 }
 0x247   : > { %v792_v15 = vadd.f32 %v791_v14, %v706_v7 }
 0x248   : > { %v793_v16 = vpop.f32.mrf.mxu1 }
 0x249   : > { %804 = vst [vmem:[%s2462_s12 + $0x10] sm:$0xff] %v792_v15  ;;  %v2491_v42 = vadd.f32 %v793_v16, %v710_v23 }
 0x24a   : > { %v797_v17 = vpop.f32.mrf.mxu1 }
 0x24b   : > { %v798_v18 = vadd.f32 %v797_v17, %v706_v7 }
 0x24c   : > { %v799_v22 = vpop.f32.mrf.mxu1 }
 0x24d   : > { %805 = vst [vmem:[%s2462_s12 + $0x18] sm:$0xff] %v798_v18  ;;  %v2500_v49 = vadd.f32 %v799_v22, %v710_v23  ;;  %v2125_v23 = vmov 0   ;;  %s1978_s12 = sshll.u32 %s2128_s4, 4  ;;  %s1979_s12 = int_to_ptr.vmem [resolvable:$false] %s1978_s12 }
 0x24e   : > { %1777 = vset.pattern.permute.xlu1 %v2125_v23  ;;  %s1980_s20 = scalar_lea.vmem %s1979_s12, 1024  ;;  %p1981_p4 = scmp.lt.s32.totalorder %s2544_s16, %s1979_s12 }
 0x24f   : > { %p1982_p6 = scmp.lt.s32.totalorder %s1980_s20, %s1974_s2 }
 0x251   : > { %p1983_p1 = por %p1982_p6, %p1981_p4 }
 0x253   : > { %p1984_p5 = pnand %p1983_p1, %p1977_p2 }
 0x25e   : > { %v1032_v25 = vpop.f32.mrf.mxu1 }
 0x25f   : > { %v1033_v26 = vadd.f32 %v1032_v25, %v959_v21 }
 0x260   : > { %v1034_v27 = vpop.f32.mrf.mxu1 }
 0x261   : > { %1055 = vst [vmem:[%s2474_s28] sm:$0xff] %v1033_v26  ;;  %v2477_v29 = vadd.f32 %v1034_v27, %v963_v24  ;;  %v2126_v27 = vmov 2  }
 0x262   : > { %v1038_v30 = vpop.f32.mrf.mxu1  ;;  %1778 = vset.pattern.permute.xlu0 %v2126_v27 }
 0x263   : > { %v1523_v31 = vmul.f32 -1.442695, %v2477_v29  ;;  %v1039_v32 = vadd.f32 %v1038_v30, %v959_v21  ;;  %v1103_v33 = vsub.f32 %v2471_v28, %v2477_v29 }
 0x264   : > { %v1040_v34 = vpop.f32.mrf.mxu1 }
 0x265   : > { %1782 = vpow2.f32 %v1523_v31  ;;  %1056 = vst [vmem:[%s2474_s28 + $0x8] sm:$0xff] %v1039_v32  ;;  %v2485_v36 = vadd.f32 %v1040_v34, %v963_v24  ;;  %1111 = vrot.lane.b32.xlu0 %v1103_v33, %s2123_s19 }
 0x266   : > { %v1044_v37 = vpop.f32.mrf.mxu1 }
 0x267   : > { %v1524_v38 = vmul.f32 -1.442695, %v2485_v36  ;;  %v1045_v39 = vadd.f32 %v1044_v37, %v959_v21  ;;  %v1104_v40 = vsub.f32 %v2482_v35, %v2485_v36 }
 0x268   : > { %v1046_v41 = vpop.f32.mrf.mxu1 }
 0x269   : > { %1784 = vpow2.f32 %v1524_v38  ;;  %1057 = vst [vmem:[%s2474_s28 + $0x10] sm:$0xff] %v1045_v39  ;;  %v2494_v43 = vadd.f32 %v1046_v41, %v963_v24  ;;  %1113 = vrot.lane.b32.xlu0 %v1104_v40, %s2123_s19 }
 0x26a   : > { %v1050_v44 = vpop.f32.mrf.mxu1 }
 0x26b   : > { %v1525_v45 = vmul.f32 -1.442695, %v2494_v43  ;;  %v1051_v46 = vadd.f32 %v1050_v44, %v959_v21  ;;  %v1105_v47 = vsub.f32 %v2491_v42, %v2494_v43 }
 0x26c   : > { %v1052_v48 = vpop.f32.mrf.mxu1 }
 0x26d   : > { %1786 = vpow2.f32 %v1525_v45  ;;  %1058 = vst [vmem:[%s2474_s28 + $0x18] sm:$0xff] %v1051_v46  ;;  %v2503_v50 = vadd.f32 %v1052_v48, %v963_v24  ;;  %1115 = vrot.lane.b32.xlu1 %v1105_v47, %s2123_s19 }
 0x26f   : > { %v1526_v51 = vmul.f32 -1.442695, %v2503_v50  ;;  %v1106_v52 = vsub.f32 %v2500_v49, %v2503_v50 }
 0x271   : > { %1788 = vpow2.f32 %v1526_v51  ;;  %1117 = vrot.lane.b32.xlu1 %v1106_v52, %s2123_s19 }
 0x272   : > { %v1783_v53 = vpop.eup %1782 }
 0x273   : > { %v1071_v54 = vadd.f32 1.0, %v1783_v53 }
 0x275   : > { %1790 = vrcp.f32 %v1071_v54 }
 0x276   : > { %v1785_v55 = vpop.eup %1784 }
 0x277   : > { %v1072_v56 = vadd.f32 1.0, %v1785_v55 }
 0x279   : > { %1792 = vrcp.f32 %v1072_v56 }
 0x27a   : > { %v1787_v57 = vpop.eup %1786 }
 0x27b   : > { %v1073_v58 = vadd.f32 1.0, %v1787_v57 }
 0x27d   : > { %1794 = vrcp.f32 %v1073_v58 }
 0x27e   : > { %v1789_v59 = vpop.eup %1788 }
 0x27f   : > { %v1074_v60 = vadd.f32 1.0, %v1789_v59 }
 0x281   : > { %1796 = vrcp.f32 %v1074_v60 }
 0x282   : > { %v2510_v61 = vpop.eup %1790 }
 0x283   : > { %1087 = vrot.lane.b32.xlu0 %v2510_v61, %s2123_s19 }
 0x286   : > { %v2514_v62 = vpop.eup %1792 }
 0x287   : > { %1089 = vrot.lane.b32.xlu1 %v2514_v62, %s2123_s19 }
 0x28a   : > { %v2518_v63 = vpop.eup %1794 }
 0x28b   : > { %1091 = vrot.lane.b32.xlu0 %v2518_v63, %s2123_s19 }
 0x28e   : > { %v2522_v0 = vpop.eup %1796 }
 0x28f   : > { %1093 = vrot.lane.b32.xlu1 %v2522_v0, %s2123_s19 }
 0x2d7   : > { %v1112_v1 = vpop.permute.xlu0 %1111 }
 0x2d8   : > { %v1123_v2 = vmul.f32 %v1112_v1, %v2477_v29 }
 0x2da   : > { %v1527_v4 = vmul.f32 -1.442695, %v1123_v2 }
 0x2db   : > { %v1114_v5 = vpop.permute.xlu0 %1113 }
 0x2dc   : > { %1798 = vpow2.f32 %v1527_v4  ;;  %v1124_v6 = vmul.f32 %v1114_v5, %v2485_v36 }
 0x2de   : > { %v1528_v7 = vmul.f32 -1.442695, %v1124_v6 }
 0x2df   : > { %v1116_v9 = vpop.permute.xlu1 %1115 }
 0x2e0   : > { %1800 = vpow2.f32 %v1528_v7  ;;  %v1125_v10 = vmul.f32 %v1116_v9, %v2494_v43 }
 0x2e2   : > { %v1529_v11 = vmul.f32 -1.442695, %v1125_v10 }
 0x2e3   : > { %v1118_v8 = vpop.permute.xlu1 %1117 }
 0x2e4   : > { %1802 = vpow2.f32 %v1529_v11  ;;  %v1126_v12 = vmul.f32 %v1118_v8, %v2503_v50 }
 0x2e6   : > { %v1530_v13 = vmul.f32 -1.442695, %v1126_v12 }
 0x2e8   : > { %1804 = vpow2.f32 %v1530_v13 }
 0x2e9   : > { %v1799_v14 = vpop.eup %1798 }
 0x2ea   : > { %v1139_v15 = vadd.f32 1.0, %v1799_v14 }
 0x2ec   : > { %1806 = vrcp.f32 %v1139_v15 }
 0x2ed   : > { %v1801_v16 = vpop.eup %1800 }
 0x2ee   : > { %v1140_v17 = vadd.f32 1.0, %v1801_v16 }
 0x2f0   : > { %1808 = vrcp.f32 %v1140_v17 }
 0x2f1   : > { %v1803_v18 = vpop.eup %1802 }
 0x2f2   : > { %v1141_v19 = vadd.f32 1.0, %v1803_v18 }
 0x2f4   : > { %1810 = vrcp.f32 %v1141_v19 }
 0x2f5   : > { %v1805_v20 = vpop.eup %1804  ;;  %v1088_v30 = vpop.permute.xlu0 %1087 }
 0x2f6   : > { %v1142_v21 = vadd.f32 1.0, %v1805_v20  ;;  %v1099_v33 = vsub.f32 %v2510_v61, %v1088_v30 }
 0x2f8   : > { %1812 = vrcp.f32 %v1142_v21 }
 0x2f9   : > { %v1807_v22 = vpop.eup %1806  ;;  %v1090_v31 = vpop.permute.xlu1 %1089 }
 0x2fa   : > { %1155 = vrot.lane.b32.xlu0 %v1807_v22, %s2124_s26  ;;  %v1100_v39 = vsub.f32 %v2514_v62, %v1090_v31 }
 0x2fd   : > { %v1809_v24 = vpop.eup %1808  ;;  %v1092_v32 = vpop.permute.xlu0 %1091 }
 0x2fe   : > { %1157 = vrot.lane.b32.xlu1 %v1809_v24, %s2124_s26  ;;  %v1101_v44 = vsub.f32 %v2518_v63, %v1092_v32 }
 0x301   : > { %v1811_v25 = vpop.eup %1810  ;;  %v1094_v34 = vpop.permute.xlu1 %1093 }
 0x302   : > { %1159 = vrot.lane.b32.xlu0 %v1811_v25, %s2124_s26  ;;  %v1102_v47 = vsub.f32 %v2522_v0, %v1094_v34 }
 0x305   : > { %v1813_v26 = vpop.eup %1812 }
 0x306   : > { %1161 = vrot.lane.b32.xlu1 %v1813_v26, %s2124_s26 }
 0x36c   : > { %v1156_v37 = vpop.permute.xlu0 %1155 }
 0x36d   : > { %v1167_v38 = vmul.f32 %v1156_v37, %v1099_v33 }
 0x36f   : > { %1175 = vrot.lane.b32.xlu0 %v1167_v38, %s2127_s30 }
 0x370   : > { %v1158_v40 = vpop.permute.xlu1 %1157 }
 0x371   : > { %v1168_v41 = vmul.f32 %v1158_v40, %v1100_v39 }
 0x373   : > { %1177 = vrot.lane.b32.xlu1 %v1168_v41, %s2127_s30 }
 0x374   : > { %v1160_v45 = vpop.permute.xlu0 %1159 }
 0x375   : > { %v1169_v46 = vmul.f32 %v1160_v45, %v1101_v44 }
 0x377   : > { %1179 = vrot.lane.b32.xlu0 %v1169_v46, %s2127_s30 }
 0x378   : > { %v1162_v48 = vpop.permute.xlu1 %1161 }
 0x379   : > { %v1170_v51 = vmul.f32 %v1162_v48, %v1102_v47 }
 0x37b   : > { %1181 = vrot.lane.b32.xlu1 %v1170_v51, %s2127_s30 }
 0x37f   : > { %1221 = vperm.xlu1 %1777, %v2471_v28  }
 0x383   : > { %1779 = vset.pattern.permute.xlu1 %v2126_v27 }
 0x3e1   : > { %v1176_v52 = vpop.permute.xlu0 %1175 }
 0x3e2   : > { %v1187_v53 = vadd.f32 %v2510_v61, %v1176_v52 }
 0x3e4   : > { %1196 = vperm.xlu0 %1778, %v1187_v53  }
 0x3e5   : > { %v1178_v54 = vpop.permute.xlu1 %1177 }
 0x3e6   : > { %v1188_v55 = vadd.f32 %v2514_v62, %v1178_v54 }
 0x3e8   : > { %1201 = vperm.xlu1 %1779, %v1188_v55  }
 0x3e9   : > { %v1180_v56 = vpop.permute.xlu0 %1179 }
 0x3ea   : > { %v1189_v57 = vadd.f32 %v2518_v63, %v1180_v56 }
 0x3ec   : > { %1206 = vperm.xlu1 %1779, %v1189_v57  }
 0x3ed   : > { %v1182_v58 = vpop.permute.xlu1 %1181 }
 0x3ee   : > { %v1190_v28 = vadd.f32 %v2522_v0, %v1182_v58 }
 0x3f0   : > { %1211 = vperm.xlu0 %1778, %v1190_v28   ;;  %1781 = vset.pattern.permute.xlu1 %v2125_v23 }
 0x3f1   : > { %1231 = vperm.xlu1 %1781, %v2491_v42  }
 0x3f2   : > { %1987 = shalt.err (!%p1984_p5)
}
 0x3f3   : > { %s1988_s25 = scalar_lea.hbm %s2555_s17, 512  ;;  %s1992_s28 = scalar_lea.hbm %s2695_s11, 1024 }
 0x3f4   : > { %p1989_p8 = scmp.ne.s32.totalorder %s2555_s17, %s1988_s25  ;;  %p1993_p12 = scmp.lt.s32.totalorder %s2555_s17, %s2695_s11 }
 0x3f5   : > { %p1994_p7 = scmp.lt.s32.totalorder %s1992_s28, %s1988_s25 }
 0x3f6   : > { %p1990_p11 = pnand %p1989_p8, %p2741_p10 }
 0x3f7   : > { %p1995_p9 = por %p1994_p7, %p1993_p12 }
 0x3f8   : > { %p1991_p13 = pneg %p1990_p11 }
 0x3fa   : > { %p1996_p0 = pnand %p1995_p9, %p1991_p13 }
 0x3fc   : > { %1999 = shalt.err (!%p1996_p0)
}
 0x3fd   : > { %s2129_s30 = smov 128   ;;  %s2130_s27 = smov 8   ;;  %1780 = vset.pattern.permute.xlu0 %v2125_v23  ;;  %1236 = vperm.xlu1 %1781, %v2500_v49  }
 0x3fe   : > { %1684 = dma.vmem_to_hbm [thread:$0]  (%p2741_p10), %s2544_s16, 512, %s2555_s17, %s2559_s14, %s2129_s30, %s2129_s30, %s2130_s27   ;;  %1226 = vperm.xlu0 %1780, %v2482_v35  }
 0x3ff   : > { %s2592_s4 = scalar_lea.hbm %s2694_s10, %s2548_s13  ;;  %s1248_s12 = scalar_lea.sflag [#allocation4], %s2400_s21 }
 0x400   : > { %s2000_s20 = scalar_lea.vmem %s2542_s8, 512  ;;  %s2131_s25 = smov [#allocation13]  }
 0x401   : > { %p2001_p3 = scmp.ne.s32.totalorder %s2542_s8, %s2000_s20  ;;  %s2004_s29 = sshll.u32 %s2131_s25, 4  ;;  %s2005_s29 = int_to_ptr.vmem [resolvable:$false] %s2004_s29 }
 0x402   : > { %s2006_s16 = scalar_lea.vmem %s2005_s29, 1024  ;;  %p2007_p6 = scmp.lt.s32.totalorder %s2542_s8, %s2005_s29 }
 0x403   : > { %p2002_p2 = pnand %p2001_p3, %p2741_p10  ;;  %p2008_p1 = scmp.lt.s32.totalorder %s2006_s16, %s2000_s20 }
 0x405   : > { %p2003_p4 = pneg %p2002_p2  ;;  %p2009_p5 = por %p2008_p1, %p2007_p6 }
 0x407   : > { %p2010_p8 = pnand %p2009_p5, %p2003_p4 }
 0x409   : > { %2013 = shalt.err (!%p2010_p8)
}
 0x40a   : > { %s2014_s17 = scalar_lea.hbm %s2592_s4, 512  ;;  %s2018_s28 = scalar_lea.hbm %s2694_s10, 1024 }
 0x40b   : > { %p2015_p11 = scmp.ne.s32.totalorder %s2592_s4, %s2014_s17  ;;  %p2019_p7 = scmp.lt.s32.totalorder %s2592_s4, %s2694_s10 }
 0x40c   : > { %p2020_p9 = scmp.lt.s32.totalorder %s2018_s28, %s2014_s17 }
 0x40d   : > { %p2016_p13 = pnand %p2015_p11, %p2741_p10 }
 0x40e   : > { %p2021_p0 = por %p2020_p9, %p2019_p7 }
 0x40f   : > { %p2017_p12 = pneg %p2016_p13 }
 0x411   : > { %p2022_p3 = pnand %p2021_p0, %p2017_p12 }
 0x413   : > { %2025 = shalt.err (!%p2022_p3)
}
 0x414   : > { %1683 = dma.vmem_to_hbm [thread:$0]  (%p2741_p10), %s2542_s8, 512, %s2592_s4, %s1248_s12, %s2129_s30, %s2129_s30, %s2130_s27   ;;  %v1192_v35 = vand.u32 127, %v703_v3  ;;  %v1222_v42 = vpop.permute.xlu1 %1221 }
 0x415   : > { %s547_s18 = scalar_lea.vmem [#allocation16], %s2403_s23  ;;  %s2742_s4 = sld [smem:[#allocation33_spill]] }
 0x416   : > { %vm1193_vm0 = vcmp.eq.s32.totalorder %v1192_v35, 4  ;;  %vm1218_vm1 = vcmp.eq.s32.totalorder %v1192_v35, 5  ;;  %s1303_s8 = sshll.u32 %s547_s18, 4  ;;  %s2132_s25 = smov [#allocation16]   ;;  %s2626_s8 = int_to_ptr.vmem [resolvable:$true] %s1303_s8 }
 0x417   : > { %s2026_s20 = scalar_lea.vmem %s2626_s8, 512  ;;  %s2030_s29 = sshll.u32 %s2132_s25, 4  ;;  %s2031_s29 = int_to_ptr.vmem [resolvable:$false] %s2030_s29 }
 0x418   : > { %p2027_p2 = scmp.ne.s32.totalorder %s2626_s8, %s2026_s20  ;;  %s2032_s16 = scalar_lea.vmem %s2031_s29, 1024 }
 0x419   : > { %p2033_p1 = scmp.lt.s32.totalorder %s2626_s8, %s2031_s29  ;;  %p2034_p5 = scmp.lt.s32.totalorder %s2032_s16, %s2026_s20 }
 0x41a   : > { %p2028_p4 = pnand %p2027_p2, %p2741_p10 }
 0x41b   : > { %s2636_s12 = scalar_lea.hbm %s2742_s4, %s2548_s13  ;;  %p2035_p8 = por %p2034_p5, %p2033_p1 }
 0x41c   : > { %p2029_p6 = pneg %p2028_p4 }
 0x41e   : > { %p2036_p11 = pnand %p2035_p8, %p2029_p6 }
 0x45f   : > { %v1197_v49 = vpop.permute.xlu0 %1196 }
 0x460   : > { %v1214_v59 = vsel %vm1193_vm0, %v1197_v49, %v2477_v29 }
 0x461   : > { %v1239_v60 = vsel %vm1218_vm1, %v1222_v42, %v1214_v59 }
 0x462   : > { %1243 = vst [vmem:[%s547_s18] sm:$0xff] %v1239_v60 }
 0x463   : > { %v1202_v61 = vpop.permute.xlu1 %1201 }
 0x464   : > { %v1215_v29 = vsel %vm1193_vm0, %v1202_v61, %v2485_v36 }
 0x467   : > { %v1207_v62 = vpop.permute.xlu1 %1206 }
 0x468   : > { %v1216_v0 = vsel %vm1193_vm0, %v1207_v62, %v2494_v43 }
 0x46b   : > { %v1212_v63 = vpop.permute.xlu0 %1211 }
 0x46c   : > { %v1232_v1 = vpop.permute.xlu1 %1231  ;;  %v1217_v2 = vsel %vm1193_vm0, %v1212_v63, %v2503_v50 }
 0x46d   : > { %v1241_v3 = vsel %vm1218_vm1, %v1232_v1, %v1216_v0 }
 0x46e   : > { %1245 = vst [vmem:[%s547_s18 + $0x10] sm:$0xff] %v1241_v3 }
 0x478   : > { %v1237_v4 = vpop.permute.xlu1 %1236 }
 0x479   : > { %v1227_v5 = vpop.permute.xlu0 %1226  ;;  %v1242_v43 = vsel %vm1218_vm1, %v1237_v4, %v1217_v2 }
 0x47a   : > { %v1240_v6 = vsel %vm1218_vm1, %v1227_v5, %v1215_v29  ;;  %1246 = vst [vmem:[%s547_s18 + $0x18] sm:$0xff] %v1242_v43 }
 0x47b   : > { %1244 = vst [vmem:[%s547_s18 + $0x8] sm:$0xff] %v1240_v6 }
 0x47c   : > { %2039 = shalt.err (!%p2036_p11)
}
 0x47d   : > { %s2040_s13 = scalar_lea.hbm %s2636_s12, 512  ;;  %s2044_s6 = scalar_lea.hbm %s2742_s4, 1024 }
 0x47e   : > { %p2041_p13 = scmp.ne.s32.totalorder %s2636_s12, %s2040_s13  ;;  %p2045_p9 = scmp.lt.s32.totalorder %s2636_s12, %s2742_s4 }
 0x47f   : > { %p2046_p0 = scmp.lt.s32.totalorder %s2044_s6, %s2040_s13 }
 0x480   : > { %p2042_p12 = pnand %p2041_p13, %p2741_p10 }
 0x481   : > { %p2047_p3 = por %p2046_p0, %p2045_p9 }
 0x482   : > { %p2043_p7 = pneg %p2042_p12 }
 0x484   : > { %p2048_p2 = pnand %p2047_p3, %p2043_p7 }
 0x486   : > { %2051 = shalt.err (!%p2048_p2)
}
 0x487   : > { %1685 = dma.vmem_to_hbm [thread:$0]  (%p2741_p10), %s2626_s8, 512, %s2636_s12, %s2559_s14, %s2129_s30, %s2129_s30, %s2130_s27  }
 0x488 PF: > { %s2743_s26 = sld [smem:[#allocation24_spill]]  ;;  %p2746_p6 = scmp.ge.s32.totalorder %s2110_s24, 2 }
 0x489   : > { %s2744_s18 = sld [smem:[#allocation26_spill]] }
 0x48e   : > { %s1318_s23 = sand.u32 1, %s2743_s26  }
 0x48f   : > { %p2745_p4 = scmp.ne.s32.totalorder %s2744_s18, 0  ;;  %s1319_s2 = scalar_lea.sflag [#allocation4], %s1318_s23 }
 0x491   : > { %p1710_p1 = pnand %p2746_p6, %p2745_p4 }
 0x493   : > { %p1711_p5 = pneg %p1710_p1 }
 0x495   : > { %2089 = dma.done.wait (%p1711_p5), %s1319_s2, 512  }
 0x496   : > { %2091 = vsyncadd (%p1711_p5), %s1319_s2, 4294966784  ;;  %s2747_s15 = sadd.s32 4294967294, %s2110_s24  }
 0x497   : > { %s1327_s20 = sand.u32 1, %s2747_s15  }
 0x498   : > { %s1328_s25 = scalar_lea.sflag [#allocation15], %s1327_s20 }
 0x499   : > { %2093 = dma.done.wait (%p1711_p5), %s1328_s25, 1024  }
 0x49a   : > { %2095 = vsyncadd (%p1711_p5), %s1328_s25, 4294966272  ;;  %s2748_s24 = sld [smem:[#allocation27_spill]]  ;;  %s2751_s21 = smov %s2102_s22 }
 0x49b   : > { %s2749_s14 = sld [smem:[#allocation25_spill]] }
 0x49c   : > { %s2750_s23 = sld [smem:[#allocation28_spill]] }
 0x4a0   : > { %p34_p10 = scmp.ge.s32.totalorder %s2748_s24, 4  }
 0x4a1   : > { %s2752_s22 = smov %s2749_s14 }
 0x4a2   :  { %36 = sbr.rel (!%p34_p10) target bundleno = 17 (0x11), region = 166 }
 0x4a7   :  { %1342 = vsyncpa [#allocation3], 1 }
 0x4a8   :  { %1344 = vsyncpa [#allocation3 + $0x1], 1 }
 0x4a9   :  { %1345 = vsyncpa [#allocation6], 1 }
 0x4aa   :  { %1347 = vsyncpa [#allocation6 + $0x1], 1 }
 0x4ab   :  { %1348 = vsyncpa [#allocation9], 1 }
 0x4ac   :  { %1349 = vsyncpa [#allocation12], 1 }
 0x4ad   :  { %1350 = vsyncpa [#allocation4], 1 }
 0x4ae   :  { %1352 = vsyncpa [#allocation4 + $0x1], 1 }
 0x4af   :  { %1353 = vsyncpa [#allocation15], 1 }
 0x4b0   :  { %1355 = vsyncpa [#allocation15 + $0x1], 1 }

// kernel: tpu_custom_call.1
= control target key start
LH: loop header
LB: loop body
LE: loop exit
PB: predicated region body
PF: predicated region fallthrough
CT: control target
= control target key end

     0   :  { %s2684_s0 = inlined_call_operand.hbm [shape: f32[64,128], index: 0, kind: input, shape index: {}]   ;;  %s2685_s1 = inlined_call_operand.hbm [shape: f32[64,128], index: 1, kind: input, shape index: {}]   ;;  %s2686_s2 = inlined_call_operand.hbm [shape: f32[128,128], index: 2, kind: input, shape index: {}]   ;;  %s2687_s3 = inlined_call_operand.vmem [shape: f32[1,128], index: 3, kind: input, shape index: {}]   ;;  %s2688_s4 = inlined_call_operand.hbm [shape: f32[128,256], index: 4, kind: input, shape index: {}]   ;;  %s2689_s5 = inlined_call_operand.vmem [shape: f32[1,256], index: 5, kind: input, shape index: {}]   ;;  %s2690_s6 = inlined_call_operand.hbm [shape: f32[128,128], index: 6, kind: input, shape index: {}]   ;;  %s2691_s7 = inlined_call_operand.vmem [shape: f32[1,128], index: 7, kind: input, shape index: {}]   ;;  %s2692_s8 = inlined_call_operand.hbm [shape: f32[128,256], index: 8, kind: input, shape index: {}]   ;;  %s2693_s9 = inlined_call_operand.vmem [shape: f32[1,256], index: 9, kind: input, shape index: {}]   ;;  %s2694_s10 = inlined_call_operand.hbm [shape: f32[64,128], index: 10, kind: output, shape index: {0}]   ;;  %s2695_s11 = inlined_call_operand.hbm [shape: f32[64,128], index: 11, kind: output, shape index: {1}]   ;;  %s2696_s12 = inlined_call_operand.hbm [shape: f32[64,128], index: 12, kind: output, shape index: {2}]  }
   0x1   :  { %2711 = sst [smem:[#allocation29_spill]] %s2686_s2 }
   0x2   :  { %2712 = sst [smem:[#allocation30_spill]] %s2688_s4 }
   0x3   :  { %2713 = sst [smem:[#allocation31_spill]] %s2690_s6 }
   0x4   :  { %2714 = sst [smem:[#allocation32_spill]] %s2692_s8 }
   0x5   :  { %2715 = sst [smem:[#allocation33_spill]] %s2696_s12 }
   0x6   :  { %18 = vsyncpa [#allocation3], 0 }
   0x7   :  { %20 = vsyncpa [#allocation3 + $0x1], 0 }
   0x8   :  { %21 = vsyncpa [#allocation6], 0 }
   0x9   :  { %23 = vsyncpa [#allocation6 + $0x1], 0 }
   0xa   :  { %24 = vsyncpa [#allocation9], 0 }
   0xb   :  { %25 = vsyncpa [#allocation12], 0 }
   0xc   :  { %26 = vsyncpa [#allocation4], 0 }
   0xd   :  { %28 = vsyncpa [#allocation4 + $0x1], 0 }
   0xe   :  { %29 = vsyncpa [#allocation15], 0 }
   0xf   :  { %31 = vsyncpa [#allocation15 + $0x1], 0  ;;  %s2198_s21 = smov 0   ;;  %s2200_s22 = smov 0  }
  0x10   :  { %s2202_s23 = smov 0   ;;  %s2204_s24 = smov 0  }
  0x11 LB: > { %2716 = sst [smem:[#allocation24_spill]] %s2098_s21  ;;  %s2219_s25 = sadd.s32 4294967295, %s2110_s24   ;;  %s2110_s24 = sphi %s2204_s24, %s2748_s24   ;;  %s2106_s23 = sphi %s2202_s23, %s2750_s23   ;;  %s2102_s22 = sphi %s2200_s22, %s2752_s22   ;;  %s2098_s21 = sphi %s2198_s21, %s2751_s21  }
  0x12   : > { %2717 = sst [smem:[#allocation25_spill]] %s2106_s23  ;;  %s2697_s26 = sadd.s32 4294967294, %s2110_s24  }
  0x13   : > { %p57_p0 = scmp.ne.s32.totalorder %s2102_s22, %s2098_s21  ;;  %p2702_p1 = scmp.eq.s32.totalorder %s2219_s25, 0 }
  0x14   : > { %p281_p3 = scmp.eq.s32.totalorder %s2697_s26, 1  ;;  %p1499_p5 = scmp.ge.s32.totalorder %s2110_s24, 1 }
  0x15   : > { %p2230_p4 = por %p2702_p1, %p57_p0  ;;  %p340_p7 = scmp.lt.s32.totalorder %s2110_s24, 3 }
  0x16   : > { %p2235_p6 = por %p281_p3, %p57_p0  ;;  %s2112_s30 = smov [#allocation7]  }
  0x17   : > { %s2718_s27 = scalar_select %p2230_p4, 1, 0 }
  0x18   : > { %s2719_s28 = scalar_select %p2235_p6, 1, 0 }
  0x19   : > { %p2240_p8 = pnand %p1499_p5, %p340_p7  ;;  %s352_s13 = sshll.u32 %s2112_s30, 4  ;;  %s353_s13 = int_to_ptr.vmem [resolvable:$true] %s352_s13 }
  0x1a   : > { %2720 = sst [smem:[#allocation26_spill]] %s2719_s28  ;;  %s2113_s15 = smov [#allocation8]  }
  0x1b   : > { %p1689_p9 = pneg %p2240_p8  ;;  %s368_s16 = sshll.u32 %s2113_s15, 4  ;;  %s369_s16 = int_to_ptr.vmem [resolvable:$true] %s368_s16 }
  0x1c   : > { %s1825_s17 = scalar_lea.vmem %s353_s13, 2048  ;;  %p1833_p5 = scmp.lt.s32.totalorder %s353_s13, %s353_s13 }
  0x1d   : > { %p2249_p11 = pnand %p1689_p9, %p2702_p1  ;;  %p1826_p13 = scmp.ne.s32.totalorder %s353_s13, %s1825_s17 }
  0x1e   : > { %p1834_p7 = scmp.lt.s32.totalorder %s1825_s17, %s1825_s17 }
  0x1f   : > { %p1816_p12 = pneg %p2249_p11 }
  0x20   : > { %p1835_p10 = por %p1834_p7, %p1833_p5 }
  0x21   : > { %p1828_p0 = pnand %p1826_p13, %p1816_p12 }
  0x23   : > { %p1829_p3 = pneg %p1828_p0 }
  0x25   : > { %p1836_p9 = pnand %p1835_p10, %p1829_p3 }
  0x27   : > { %1839 = shalt.err (!%p1836_p9)
}
  0x28   : > { %s2698_s18 = smov 128   ;;  %s2700_s19 = smov 8  }
  0x29   : > { %s2723_s2 = sld [smem:[#allocation29_spill]]  ;;  %s1851_s15 = scalar_lea.vmem %s369_s16, 4096 }
  0x2a   : > { %p1852_p13 = scmp.ne.s32.totalorder %s369_s16, %s1851_s15  ;;  %p1859_p10 = scmp.lt.s32.totalorder %s369_s16, %s369_s16 }
  0x2b   : > { %p1860_p3 = scmp.lt.s32.totalorder %s1851_s15, %s1851_s15 }
  0x2c   : > { %p1854_p0 = pnand %p1852_p13, %p1816_p12 }
  0x2d   : > { %p1861_p7 = por %p1860_p3, %p1859_p10 }
  0x2e   : > { %p1855_p5 = pneg %p1854_p0 }
  0x2f   : > { %1692 = dma.hbm_to_vmem [thread:$0]  (!%p2249_p11), %s2723_s2, 2048, %s353_s13, [#allocation6], %s2698_s18, %s2698_s18, %s2700_s19  }
  0x30   : > { %p1862_p9 = pnand %p1861_p7, %p1855_p5 }
  0x32   : > { %1865 = shalt.err (!%p1862_p9)
}
  0x33   : > { %s2116_s17 = smov 256   ;;  %s2117_s26 = smov 16  }
  0x34   : > { %s2724_s4 = sld [smem:[#allocation30_spill]]  ;;  %s2118_s30 = smov [#allocation10]  }
  0x35   : > { %s384_s18 = sshll.u32 %s2118_s30, 4  ;;  %s2119_s19 = smov [#allocation11]   ;;  %s385_s18 = int_to_ptr.vmem [resolvable:$true] %s384_s18 }
  0x36   : > { %s400_s2 = sshll.u32 %s2119_s19, 4  ;;  %s1877_s15 = scalar_lea.vmem %s385_s18, 2048  ;;  %s401_s2 = int_to_ptr.vmem [resolvable:$true] %s400_s2 }
  0x37   : > { %p1878_p13 = scmp.ne.s32.totalorder %s385_s18, %s1877_s15  ;;  %p1885_p10 = scmp.lt.s32.totalorder %s385_s18, %s385_s18 }
  0x38   : > { %p1886_p3 = scmp.lt.s32.totalorder %s1877_s15, %s1877_s15 }
  0x39   : > { %p1880_p0 = pnand %p1878_p13, %p1816_p12 }
  0x3a   : > { %1695 = dma.hbm_to_vmem [thread:$0]  (!%p2249_p11), %s2724_s4, 4096, %s369_s16, [#allocation9], %s2116_s17, %s2116_s17, %s2117_s26  }
  0x3b   : > { %p1881_p5 = pneg %p1880_p0  ;;  %p1887_p7 = por %p1886_p3, %p1885_p10 }
  0x3d   : > { %p1888_p9 = pnand %p1887_p7, %p1881_p5 }
  0x3f   : > { %1891 = shalt.err (!%p1888_p9)
}
  0x40   : > { %s2725_s16 = smov 8   ;;  %s2726_s13 = smov 128  }
  0x41   : > { %s2727_s6 = sld [smem:[#allocation31_spill]]  ;;  %s1903_s30 = scalar_lea.vmem %s401_s2, 4096 }
  0x42   : > { %p1904_p1 = scmp.ne.s32.totalorder %s401_s2, %s1903_s30  ;;  %p1911_p2 = scmp.lt.s32.totalorder %s401_s2, %s401_s2 }
  0x43   : > { %p1912_p10 = scmp.lt.s32.totalorder %s1903_s30, %s1903_s30 }
  0x44   : > { %p1906_p13 = pnand %p1904_p1, %p1816_p12 }
  0x45   : > { %p1913_p5 = por %p1912_p10, %p1911_p2 }
  0x46   : > { %p1907_p0 = pneg %p1906_p13 }
  0x47   : > { %1698 = dma.hbm_to_vmem [thread:$0]  (!%p2249_p11), %s2727_s6, 2048, %s385_s18, [#allocation9], %s2726_s13, %s2726_s13, %s2725_s16  }
  0x48   : > { %p1914_p3 = pnand %p1913_p5, %p1907_p0 }
  0x4a   : > { %1917 = shalt.err (!%p1914_p3)
}
  0x4b   : > { %s2728_s8 = sld [smem:[#allocation32_spill]]  ;;  %s2300_s18 = sadd.s32 1, %s2110_s24  }
  0x4c   : > { %2729 = sst [smem:[#allocation27_spill]] %s2300_s18  ;;  %s41_s14 = ssub.s32 %s2110_s24, %s2300_s18 }
  0x4d   : > { %p42_p1 = scmp.eq.s32.totalorder %s41_s14, 0  ;;  %s44_s19 = sadd.s32 1, %s2106_s23 }
  0x4e   : > { %p51_p2 = scmp.ne.s32.totalorder %s2106_s23, %s2102_s22  ;;  %p52_p12 = scmp.eq.s32.totalorder %s2110_s24, 0 }
  0x4f   : > { %s2309_s30 = scalar_select %p42_p1, %s2106_s23, %s44_s19  }
  0x50   : > { %p53_p7 = por %p52_p12, %p51_p2  ;;  %p2731_p9 = scmp.eq.s32.totalorder %s2219_s25, 1 }
  0x51   : > { %1701 = dma.hbm_to_vmem [thread:$0]  (!%p2249_p11), %s2728_s8, 4096, %s401_s2, [#allocation12], %s2116_s17, %s2116_s17, %s2117_s26  }
  0x52   : > { %2730 = sst [smem:[#allocation28_spill]] %s2309_s30  ;;  %p2313_p13 = por %p2731_p9, %p51_p2 }
  0x53   : > { %p1723_p0 = scmp.lt.s32.totalorder %s2110_s24, 2  ;;  %s417_s20 = sand.u32 1, %s2106_s23  }
  0x54   : > { %s2732_s15 = scalar_select %p2313_p13, 1, 0 }
  0x55   : > { %s1505_s4 = sshll.u32 %s417_s20, 5  ;;  %s1542_s2 = sshll.u32 %s2110_s24, 9 }
  0x56   : > { %s2323_s6 = scalar_lea.hbm %s2684_s0, %s1542_s2  ;;  %s421_s14 = scalar_lea.vmem [#allocation2], %s1505_s4 }
  0x57   : > { %s428_s19 = sshll.u32 %s421_s14, 4  ;;  %p2327_p11 = pnand %p1723_p0, %p53_p7  ;;  %s2325_s19 = int_to_ptr.vmem [resolvable:$true] %s428_s19 }
  0x58   : > { %s2334_s18 = scalar_lea.hbm %s2685_s1, %s1542_s2  ;;  %s442_s26 = scalar_lea.vmem [#allocation5], %s1505_s4 }
  0x59   : > { %s2336_s17 = sshll.u32 %s442_s26, 4  ;;  %s2338_s28 = scalar_lea.sflag [#allocation3], %s417_s20  ;;  %s2369_s17 = int_to_ptr.vmem [resolvable:$true] %s2336_s17 }
  0x5a   : > { %s1918_s21 = scalar_lea.hbm %s2323_s6, 512  ;;  %p1920_p5 = pneg %p2327_p11 }
  0x5b   : > { %p1919_p10 = scmp.ne.s32.totalorder %s2323_s6, %s1918_s21  ;;  %s1923_s23 = scalar_lea.hbm %s2684_s0, 1024 }
  0x5c   : > { %p1924_p2 = scmp.lt.s32.totalorder %s2323_s6, %s2684_s0  ;;  %p1925_p12 = scmp.lt.s32.totalorder %s1923_s23, %s1918_s21 }
  0x5d   : > { %p1921_p3 = pnand %p1920_p5, %p1919_p10 }
  0x5e   : > { %p1926_p7 = por %p1925_p12, %p1924_p2 }
  0x5f   : > { %p1922_p1 = pneg %p1921_p3 }
  0x61   : > { %p1927_p9 = pnand %p1926_p7, %p1922_p1 }
  0x63   : > { %1930 = shalt.err (!%p1927_p9)
}
  0x64   : > { %s1931_s4 = scalar_lea.vmem %s2325_s19, 512  ;;  %s2120_s12 = smov [#allocation2]  }
  0x65   : > { %p1932_p0 = scmp.ne.s32.totalorder %s2325_s19, %s1931_s4  ;;  %s1936_s20 = sshll.u32 %s2120_s12, 4  ;;  %s1937_s20 = int_to_ptr.vmem [resolvable:$false] %s1936_s20 }
  0x66   : > { %s1938_s26 = scalar_lea.vmem %s1937_s20, 1024  ;;  %p1939_p6 = scmp.lt.s32.totalorder %s2325_s19, %s1937_s20 }
  0x67   : > { %p1934_p10 = pnand %p1932_p0, %p1920_p5  ;;  %p1940_p13 = scmp.lt.s32.totalorder %s1938_s26, %s1931_s4 }
  0x69   : > { %p1935_p3 = pneg %p1934_p10  ;;  %p1941_p4 = por %p1940_p13, %p1939_p6 }
  0x6b   : > { %p1942_p2 = pnand %p1941_p4, %p1935_p3 }
  0x6d   : > { %1945 = shalt.err (!%p1942_p2)
}
  0x6e   : > { %1705 = dma.hbm_to_vmem [thread:$0]  (!%p2327_p11), %s2323_s6, 512, %s2325_s19, %s2338_s28, %s2726_s13, %s2726_s13, %s2725_s16  }
  0x6f   : > { %s438_s21 = sand.u32 1, %s2110_s24   ;;  %s1946_s23 = scalar_lea.hbm %s2334_s18, 512 }
  0x70   : > { %s439_s14 = scalar_lea.sflag [#allocation6], %s438_s21  ;;  %p1947_p4 = scmp.ne.s32.totalorder %s2334_s18, %s1946_s23 }
  0x71   : > { %s1951_s4 = scalar_lea.hbm %s2685_s1, 1024  ;;  %p1952_p1 = scmp.lt.s32.totalorder %s2334_s18, %s2685_s1 }
  0x72   : > { %p1949_p6 = pnand %p1947_p4, %p1920_p5  ;;  %p1953_p12 = scmp.lt.s32.totalorder %s1951_s4, %s1946_s23 }
  0x74   : > { %p1950_p13 = pneg %p1949_p6  ;;  %p1954_p7 = por %p1953_p12, %p1952_p1 }
  0x76   : > { %p1955_p9 = pnand %p1954_p7, %p1950_p13 }
  0x78   : > { %1958 = shalt.err (!%p1955_p9)
}
  0x79   : > { %s1959_s6 = scalar_lea.vmem %s2369_s17, 512  ;;  %s2121_s28 = smov [#allocation5]  }
  0x7a   : > { %p1960_p0 = scmp.ne.s32.totalorder %s2369_s17, %s1959_s6  ;;  %s1964_s19 = sshll.u32 %s2121_s28, 4  ;;  %s1965_s19 = int_to_ptr.vmem [resolvable:$false] %s1964_s19 }
  0x7b   : > { %s1966_s26 = scalar_lea.vmem %s1965_s19, 1024  ;;  %p1967_p2 = scmp.lt.s32.totalorder %s2369_s17, %s1965_s19 }
  0x7c   : > { %p1962_p10 = pnand %p1960_p0, %p1920_p5  ;;  %p1968_p4 = scmp.lt.s32.totalorder %s1966_s26, %s1959_s6 }
  0x7e   : > { %p1963_p3 = pneg %p1962_p10  ;;  %p1969_p6 = por %p1968_p4, %p1967_p2 }
  0x80   : > { %p1970_p1 = pnand %p1969_p6, %p1963_p3 }
  0x82   : > { %1973 = shalt.err (!%p1970_p1)
}
  0x83   : > { %1708 = dma.hbm_to_vmem [thread:$0]  (!%p2327_p11), %s2334_s18, 512, %s2369_s17, %s439_s14, %s2726_s13, %s2726_s13, %s2725_s16  }
  0x84   : > { %461 = sbr.rel (%p2240_p8) target bundleno = 1160 (0x488), region = 60  ;;  %s2400_s21 = sand.u32 (!%p2240_p8), 1, %s2102_s22  }
  0x85   : > { %s2403_s23 = sshll.u32 (!%p2240_p8), %s2400_s21, 5  ;;  %s464_s30 = scalar_lea.sflag (!%p2240_p8), [#allocation3], %s2400_s21 }
  0x86   : > { %s2407_s8 = scalar_lea.vmem (!%p2240_p8), [#allocation2], %s2403_s23  ;;  %p2734_p5 = scmp.ne.s32.totalorder (!%p2240_p8), %s2718_s27, 0 }
  0x89   : > { %2069 = dma.done.wait (%p2734_p5), %s464_s30, 512  }
  0x8a   : > { %2071 = vsyncadd (%p2734_p5), %s464_s30, 4294966784  ;;  %s472_s29 = sand.u32 1, %s2219_s25   ;;  %s2417_s13 = scalar_lea.vmem [#allocation5], %s2403_s23 }
  0x8b   : > { %s473_s16 = scalar_lea.sflag [#allocation6], %s472_s29 }
  0x8c   : > { %2073 = dma.done.wait (%p2734_p5), %s473_s16, 512  }
  0x8d   : > { %2075 = vsyncadd (%p2734_p5), %s473_s16, 4294966784  ;;  %p2735_p8 = scmp.eq.s32.totalorder %s2219_s25, 0 }
  0x8f   : > { %2077 = dma.done.wait (%p2735_p8), [#allocation6], 2048   ;;  %p2736_p11 = pmov %p2735_p8 }
  0x90   : > { %p2737_p13 = pmov %p2735_p8 }
  0x91   : > { %2079 = vsyncadd (%p2736_p11), [#allocation6], 4294965248 }
  0x92   : > { %2081 = dma.done.wait (%p2737_p13), [#allocation9], 6144   ;;  %p2738_p12 = pmov %p2735_p8 }
  0x93   : > { %p2739_p7 = pmov %p2735_p8 }
  0x94   : > { %2083 = vsyncadd (%p2738_p12), [#allocation9], 4294961152 }
  0x95   : > { %2085 = dma.done.wait (%p2739_p7), [#allocation12], 4096   ;;  %p2740_p9 = pmov %p2739_p7 }
  0x96   : > { %v572_v0 = vld [vmem:[#allocation7 + $0x78] sm:$0xff]  ;;  %v571_v1 = vld [vmem:[#allocation7 + $0x70] sm:$0xff]  ;;  %v570_v2 = vld [vmem:[#allocation7 + $0x68] sm:$0xff]  ;;  %s2462_s12 = scalar_lea.vmem [#allocation13], %s2403_s23  ;;  %s2474_s28 = scalar_lea.vmem [#allocation14], %s2403_s23 }
  0x97   : > { %2087 = vsyncadd (%p2740_p9), [#allocation12], 4294963200  ;;  %1587 = vmatprep.subr.mxu0 %v572_v0  ;;  %v569_v3 = vld [vmem:[#allocation7 + $0x60] sm:$0xff]  ;;  %v568_v5 = vld [vmem:[#allocation7 + $0x58] sm:$0xff]  ;;  %s2123_s19 = smov 1   ;;  %s2124_s26 = smov 2  }
  0x98   : > { %1588 = vmatpush3.msra.mxu0 %v572_v0  ;;  %v553_v4 = vld [vmem:[%s2407_s8] sm:$0xff]  ;;  %v567_v6 = vld [vmem:[#allocation7 + $0x50] sm:$0xff]  ;;  %v566_v7 = vld [vmem:[#allocation7 + $0x48] sm:$0xff]  ;;  %s2127_s30 = smov 127   ;;  %s1287_s16 = sshll.u32 %s2474_s28, 4  ;;  %s2544_s16 = int_to_ptr.vmem [resolvable:$true] %s1287_s16 }
  0x99   : > { %1589 = vmatprep.subr.mxu0 %v571_v1  ;;  %1619 = vmatprep.mubr.f32.mxu0 %v553_v4  ;;  %v565_v8 = vld [vmem:[#allocation7 + $0x40] sm:$0xff]  ;;  %v700_v9 = vld [vmem:[#allocation8 + $0xf8] sm:$0xff]  ;;  %v699_v10 = vld [vmem:[#allocation8 + $0xf0] sm:$0xff]  ;;  %s2559_s14 = scalar_lea.sflag [#allocation15], %s472_s29  ;;  %s1974_s2 = scalar_lea.vmem %s2544_s16, 512 }
  0x9a   : > { %1590 = vmatpush3.msra.mxu0 %v571_v1  ;;  %v564_v11 = vld [vmem:[#allocation7 + $0x38] sm:$0xff]  ;;  %713 = vmatprep.subr.mxu1 %v700_v9  ;;  %v698_v12 = vld [vmem:[#allocation8 + $0xe8] sm:$0xff]  ;;  %v697_v13 = vld [vmem:[#allocation8 + $0xe0] sm:$0xff]  ;;  %p1975_p0 = scmp.ne.s32.totalorder %s2544_s16, %s1974_s2  ;;  %p2741_p10 = scmp.ne.s32.totalorder %s2732_s15, 0 }
  0x9b   : > { %1591 = vmatprep.subr.mxu0 %v570_v2  ;;  %714 = vmatpush1.msra.mxu1 %v699_v10  ;;  %v696_v14 = vld [vmem:[#allocation8 + $0xd8] sm:$0xff]  ;;  %v563_v15 = vld [vmem:[#allocation7 + $0x30] sm:$0xff]  ;;  %v694_v17 = vld [vmem:[#allocation8 + $0xc8] sm:$0xff]  ;;  %s2128_s4 = smov [#allocation14]  }
  0x9c   : > { %1592 = vmatpush3.msra.mxu0 %v570_v2  ;;  %715 = vmatprep.subr.mxu1 %v698_v12  ;;  %v695_v16 = vld [vmem:[#allocation8 + $0xd0] sm:$0xff]  ;;  %v562_v18 = vld [vmem:[#allocation7 + $0x28] sm:$0xff]  ;;  %v693_v19 = vld [vmem:[#allocation8 + $0xc0] sm:$0xff]  ;;  %p1976_p3 = pnand %p1975_p0, %p2741_p10 }
  0x9d   : > { %1593 = vmatprep.subr.mxu0 %v569_v3  ;;  %716 = vmatpush1.msra.mxu1 %v697_v13  ;;  %v692_v20 = vld [vmem:[#allocation8 + $0xb8] sm:$0xff]  ;;  %v561_v21 = vld [vmem:[#allocation7 + $0x20] sm:$0xff]  ;;  %v691_v22 = vld [vmem:[#allocation8 + $0xb0] sm:$0xff] }
  0x9e   : > { %1594 = vmatpush3.msra.mxu0 %v569_v3  ;;  %717 = vmatprep.subr.mxu1 %v696_v14  ;;  %v690_v23 = vld [vmem:[#allocation8 + $0xa8] sm:$0xff]  ;;  %v560_v24 = vld [vmem:[#allocation7 + $0x18] sm:$0xff]  ;;  %v689_v25 = vld [vmem:[#allocation8 + $0xa0] sm:$0xff]  ;;  %p1977_p2 = pneg %p1976_p3 }
  0x9f   : > { %1595 = vmatprep.subr.mxu0 %v568_v5  ;;  %718 = vmatpush1.msra.mxu1 %v695_v16  ;;  %v688_v26 = vld [vmem:[#allocation8 + $0x98] sm:$0xff]  ;;  %v559_v27 = vld [vmem:[#allocation7 + $0x10] sm:$0xff]  ;;  %v686_v29 = vld [vmem:[#allocation8 + $0x88] sm:$0xff] }
  0xa0   : > { %1596 = vmatpush3.msra.mxu0 %v568_v5  ;;  %719 = vmatprep.subr.mxu1 %v694_v17  ;;  %v687_v28 = vld [vmem:[#allocation8 + $0x90] sm:$0xff]  ;;  %v558_v30 = vld [vmem:[#allocation7 + $0x8] sm:$0xff]  ;;  %v685_v31 = vld [vmem:[#allocation8 + $0x80] sm:$0xff] }
  0xa1   : > { %1597 = vmatprep.subr.mxu0 %v567_v6  ;;  %720 = vmatpush1.msra.mxu1 %v693_v19  ;;  %v684_v32 = vld [vmem:[#allocation8 + $0x78] sm:$0xff]  ;;  %v557_v33 = vld [vmem:[#allocation7] sm:$0xff]  ;;  %v683_v34 = vld [vmem:[#allocation8 + $0x70] sm:$0xff] }
  0xa2   : > { %1598 = vmatpush3.msra.mxu0 %v567_v6  ;;  %721 = vmatprep.subr.mxu1 %v692_v20  ;;  %v682_v35 = vld [vmem:[#allocation8 + $0x68] sm:$0xff]  ;;  %v825_v37 = vld [vmem:[#allocation10 + $0x78] sm:$0xff]  ;;  %v555_v38 = vld [vmem:[%s2407_s8 + $0x10] sm:$0xff] }
  0xa3   : > { %1599 = vmatprep.subr.mxu0 %v566_v7  ;;  %722 = vmatpush1.msra.mxu1 %v691_v22  ;;  %v554_v36 = vld [vmem:[%s2407_s8 + $0x8] sm:$0xff]  ;;  %v824_v39 = vld [vmem:[#allocation10 + $0x70] sm:$0xff]  ;;  %v681_v40 = vld [vmem:[#allocation8 + $0x60] sm:$0xff] }
  0xa4   : > { %1600 = vmatpush3.msra.mxu0 %v566_v7  ;;  %723 = vmatprep.subr.mxu1 %v690_v23  ;;  %v680_v41 = vld [vmem:[#allocation8 + $0x58] sm:$0xff]  ;;  %v823_v42 = vld [vmem:[#allocation10 + $0x68] sm:$0xff]  ;;  %v806_v44 = vld [vmem:[%s2417_s13] sm:$0xff] }
  0xa5   : > { %1601 = vmatprep.subr.mxu0 %v565_v8  ;;  %724 = vmatpush1.msra.mxu1 %v689_v25  ;;  %v556_v43 = vld [vmem:[%s2407_s8 + $0x18] sm:$0xff]  ;;  %v822_v45 = vld [vmem:[#allocation10 + $0x60] sm:$0xff]  ;;  %v679_v46 = vld [vmem:[#allocation8 + $0x50] sm:$0xff]  ;;  %s1271_s8 = sshll.u32 %s2462_s12, 4  ;;  %s2542_s8 = int_to_ptr.vmem [resolvable:$true] %s1271_s8 }
  0xa6   : > { %1602 = vmatpush3.msra.mxu0 %v565_v8  ;;  %725 = vmatprep.subr.mxu1 %v688_v26  ;;  %v678_v47 = vld [vmem:[#allocation8 + $0x48] sm:$0xff]  ;;  %v821_v48 = vld [vmem:[#allocation10 + $0x58] sm:$0xff]  ;;  %v677_v49 = vld [vmem:[#allocation8 + $0x40] sm:$0xff]  ;;  %v2122_v8 = vmov 0.0  }
  0xa7   : > { %1603 = vmatprep.subr.mxu0 %v564_v11  ;;  %726 = vmatpush1.msra.mxu1 %v687_v28  ;;  %v676_v50 = vld [vmem:[#allocation8 + $0x38] sm:$0xff]  ;;  %v820_v51 = vld [vmem:[#allocation10 + $0x50] sm:$0xff]  ;;  %v819_v52 = vld [vmem:[#allocation10 + $0x48] sm:$0xff] }
  0xa8   : > { %1604 = vmatpush3.msra.mxu0 %v564_v11  ;;  %727 = vmatprep.subr.mxu1 %v686_v29  ;;  %v818_v53 = vld [vmem:[#allocation10 + $0x40] sm:$0xff]  ;;  %v817_v54 = vld [vmem:[#allocation10 + $0x38] sm:$0xff]  ;;  %v816_v55 = vld [vmem:[#allocation10 + $0x30] sm:$0xff] }
  0xa9   : > { %1605 = vmatprep.subr.mxu0 %v563_v15  ;;  %728 = vmatpush1.msra.mxu1 %v685_v31  ;;  %v815_v56 = vld [vmem:[#allocation10 + $0x28] sm:$0xff]  ;;  %v814_v57 = vld [vmem:[#allocation10 + $0x20] sm:$0xff]  ;;  %v813_v58 = vld [vmem:[#allocation10 + $0x18] sm:$0xff] }
  0xaa   : > { %1606 = vmatpush3.msra.mxu0 %v563_v15  ;;  %729 = vmatprep.subr.mxu1 %v684_v32  ;;  %v812_v59 = vld [vmem:[#allocation10 + $0x10] sm:$0xff]  ;;  %v811_v60 = vld [vmem:[#allocation10 + $0x8] sm:$0xff]  ;;  %v810_v61 = vld [vmem:[#allocation10] sm:$0xff] }
  0xab   : > { %1607 = vmatprep.subr.mxu0 %v562_v18  ;;  %730 = vmatpush1.msra.mxu1 %v683_v34  ;;  %v807_v62 = vld [vmem:[%s2417_s13 + $0x8] sm:$0xff]  ;;  %v808_v63 = vld [vmem:[%s2417_s13 + $0x10] sm:$0xff]  ;;  %v809_v0 = vld [vmem:[%s2417_s13 + $0x18] sm:$0xff]  ;;  %s2548_s13 = sshll.u32 %s2219_s25, 9 }
  0xac   : > { %1608 = vmatpush3.msra.mxu0 %v562_v18  ;;  %731 = vmatprep.subr.mxu1 %v682_v35  ;;  %v675_v1 = vld [vmem:[#allocation8 + $0x30] sm:$0xff]  ;;  %v674_v2 = vld [vmem:[#allocation8 + $0x28] sm:$0xff]  ;;  %v673_v3 = vld [vmem:[#allocation8 + $0x20] sm:$0xff]  ;;  %s2555_s17 = scalar_lea.hbm %s2695_s11, %s2548_s13 }
  0xad   : > { %1609 = vmatprep.subr.mxu0 %v561_v21  ;;  %732 = vmatpush1.msra.mxu1 %v681_v40  ;;  %v672_v4 = vld [vmem:[#allocation8 + $0x18] sm:$0xff]  ;;  %v671_v5 = vld [vmem:[#allocation8 + $0x10] sm:$0xff]  ;;  %v670_v6 = vld [vmem:[#allocation8 + $0x8] sm:$0xff] }
  0xae   : > { %1610 = vmatpush3.msra.mxu0 %v561_v21  ;;  %733 = vmatprep.subr.mxu1 %v680_v41  ;;  %v669_v7 = vld [vmem:[#allocation8] sm:$0xff]  ;;  %v953_v9 = vld [vmem:[#allocation11 + $0xf8] sm:$0xff]  ;;  %v952_v17 = vld [vmem:[#allocation11 + $0xf0] sm:$0xff] }
  0xaf   : > { %1611 = vmatprep.subr.mxu0 %v560_v24  ;;  %734 = vmatpush1.msra.mxu1 %v679_v46  ;;  %v1521_v11 = vld [vmem:[%s2687_s3] ss:$0 sm:$0xff]  ;;  %v951_v18 = vld [vmem:[#allocation11 + $0xe8] sm:$0xff]  ;;  %v949_v22 = vld [vmem:[#allocation11 + $0xd8] sm:$0xff] }
  0xb0   : > { %1612 = vmatpush3.msra.mxu0 %v560_v24  ;;  %735 = vmatprep.subr.mxu1 %v678_v47  ;;  %v950_v20 = vld [vmem:[#allocation11 + $0xe0] sm:$0xff]  ;;  %v948_v24 = vld [vmem:[#allocation11 + $0xd0] sm:$0xff]  ;;  %v947_v25 = vld [vmem:[#allocation11 + $0xc8] sm:$0xff] }
  0xb1   : > { %1613 = vmatprep.subr.mxu0 %v559_v27  ;;  %736 = vmatpush1.msra.mxu1 %v677_v49  ;;  %v946_v26 = vld [vmem:[#allocation11 + $0xc0] sm:$0xff]  ;;  %v945_v29 = vld [vmem:[#allocation11 + $0xb8] sm:$0xff]  ;;  %v943_v31 = vld [vmem:[#allocation11 + $0xa8] sm:$0xff] }
  0xb2   : > { %1614 = vmatpush3.msra.mxu0 %v559_v27  ;;  %737 = vmatprep.subr.mxu1 %v676_v50  ;;  %v941_v34 = vld [vmem:[#allocation11 + $0x98] sm:$0xff]  ;;  %v940_v35 = vld [vmem:[#allocation11 + $0x90] sm:$0xff]  ;;  %v935_v40 = vld [vmem:[#allocation11 + $0x68] sm:$0xff] }
  0xb3   : > { %1615 = vmatprep.subr.mxu0 %v558_v30  ;;  %738 = vmatpush1.msra.mxu1 %v675_v1  ;;  %v934_v41 = vld [vmem:[#allocation11 + $0x60] sm:$0xff]  ;;  %v929_v46 = vld [vmem:[#allocation11 + $0x38] sm:$0xff]  ;;  %v928_v47 = vld [vmem:[#allocation11 + $0x30] sm:$0xff] }
  0xb4   : > { %1616 = vmatpush3.msra.mxu0 %v558_v30  ;;  %739 = vmatprep.subr.mxu1 %v674_v2  ;;  %v944_v30 = vld [vmem:[#allocation11 + $0xb0] sm:$0xff]  ;;  %v926_v49 = vld [vmem:[#allocation11 + $0x20] sm:$0xff] }
  0xb5   : > { %1617 = vmatprep.subr.mxu0 %v557_v33  ;;  %740 = vmatpush1.msra.mxu1 %v673_v3  ;;  %v703_v3 = vlaneseq }
  0xb6   : > { %1618 = vmatpush3.msra.mxu0 %v557_v33  ;;  %741 = vmatprep.subr.mxu1 %v672_v4  ;;  %v942_v33 = vld [vmem:[#allocation11 + $0xa0] sm:$0xff] }
  0xb7   : > { %1620 = vmatmul.mubr.f32.vlgmr.msra.gmra.mxu0 %v554_v36  ;;  %1625 = vmatprep.subr.mxu0 %v825_v37  ;;  %v939_v36 = vld [vmem:[#allocation11 + $0x88] sm:$0xff]  ;;  %v704_v4 = vshrl.u32 %v703_v3, 7 }
  0xb8   : > { %1626 = vmatpush3.msra.mxu0 %v825_v37  ;;  %1622 = vmatprep.mubr.f32.mxu0 %v555_v38  ;;  %v938_v37 = vld [vmem:[#allocation11 + $0x80] sm:$0xff]  ;;  %v937_v38 = vld [vmem:[#allocation11 + $0x78] sm:$0xff] }
  0xb9   : > { %1627 = vmatprep.subr.mxu0 %v824_v39  ;;  %742 = vmatpush1.msra.mxu1 %v671_v5  ;;  %v705_v5 = vsub.s32 0, %v704_v4 }
  0xba   : > { %1628 = vmatpush3.msra.mxu0 %v824_v39  ;;  %743 = vmatprep.subr.mxu1 %v670_v6  ;;  %v936_v39 = vld [vmem:[#allocation11 + $0x70] sm:$0xff]  ;;  %v701_v6 = vld [vmem:[%s2689_s5] sm:$0x3] }
  0xbb   : > { %1629 = vmatprep.subr.mxu0 %v823_v42  ;;  %1623 = vmatmul.mubr.f32.gmra.mxu0 %v556_v43  ;;  %v932_v43 = vld [vmem:[#allocation11 + $0x50] sm:$0xff] }
  0xbc   : > { %1630 = vmatpush3.msra.mxu0 %v823_v42  ;;  %1657 = vmatprep.mubr.f32.mxu0 %v806_v44  ;;  %v933_v42 = vld [vmem:[#allocation11 + $0x58] sm:$0xff]  ;;  %v931_v44 = vld [vmem:[#allocation11 + $0x48] sm:$0xff] }
  0xbd   : > { %1631 = vmatprep.subr.mxu0 %v822_v45  ;;  %744 = vmatpush1.msra.mxu1 %v669_v7  ;;  %v706_v7 = vrot.slane %v701_v6, %v705_v5 }
  0xbe   : > { %1632 = vmatpush3.msra.mxu0 %v822_v45  ;;  %777 = vmatprep.mubr.f32.mxu1 %v2122_v8  ;;  %v930_v45 = vld [vmem:[#allocation11 + $0x40] sm:$0xff] }
  0xbf   : > { %1633 = vmatprep.subr.mxu0 %v821_v48  ;;  %966 = vmatprep.subr.mxu1 %v953_v9 }
  0xc0   : > { %1634 = vmatpush3.msra.mxu0 %v821_v48  ;;  %v927_v48 = vld [vmem:[#allocation11 + $0x28] sm:$0xff] }
  0xc1   : > { %1635 = vmatprep.subr.mxu0 %v820_v51 }
  0xc2   : > { %1636 = vmatpush3.msra.mxu0 %v820_v51  ;;  %v925_v51 = vld [vmem:[#allocation11 + $0x18] sm:$0xff] }
  0xc3   : > { %1637 = vmatprep.subr.mxu0 %v819_v52 }
  0xc4   : > { %1638 = vmatpush3.msra.mxu0 %v819_v52  ;;  %v924_v52 = vld [vmem:[#allocation11 + $0x10] sm:$0xff] }
  0xc5   : > { %1639 = vmatprep.subr.mxu0 %v818_v53 }
  0xc6   : > { %1640 = vmatpush3.msra.mxu0 %v818_v53  ;;  %v1522_v53 = vld [vmem:[%s2691_s7] ss:$0 sm:$0xff] }
  0xc7   : > { %1641 = vmatprep.subr.mxu0 %v817_v54 }
  0xc8   : > { %1642 = vmatpush3.msra.mxu0 %v817_v54 }
  0xc9   : > { %1643 = vmatprep.subr.mxu0 %v816_v55 }
  0xca   : > { %1644 = vmatpush3.msra.mxu0 %v816_v55  ;;  %v923_v55 = vld [vmem:[#allocation11 + $0x8] sm:$0xff] }
  0xcb   : > { %1645 = vmatprep.subr.mxu0 %v815_v56 }
  0xcc   : > { %1646 = vmatpush3.msra.mxu0 %v815_v56 }
  0xcd   : > { %1647 = vmatprep.subr.mxu0 %v814_v57 }
  0xce   : > { %1648 = vmatpush3.msra.mxu0 %v814_v57  ;;  %v922_v57 = vld [vmem:[#allocation11] sm:$0xff] }
  0xcf   : > { %1649 = vmatprep.subr.mxu0 %v813_v58 }
  0xd0   : > { %1650 = vmatpush3.msra.mxu0 %v813_v58 }
  0xd1   : > { %1651 = vmatprep.subr.mxu0 %v812_v59 }
  0xd2   : > { %1652 = vmatpush3.msra.mxu0 %v812_v59 }
  0xd3   : > { %1653 = vmatprep.subr.mxu0 %v811_v60 }
  0xd4   : > { %1654 = vmatpush3.msra.mxu0 %v811_v60 }
  0xd5   : > { %1655 = vmatprep.subr.mxu0 %v810_v61 }
  0xd6   : > { %1656 = vmatpush3.msra.mxu0 %v810_v61 }
  0xd7   : > { %1658 = vmatmul.mubr.f32.vlgmr.msra.gmra.mxu0 %v807_v62 }
  0xd8   : > { %1660 = vmatprep.mubr.f32.mxu0 %v808_v63 }
  0xdb   : > { %1661 = vmatmul.mubr.f32.gmra.mxu0 %v809_v0 }
 0x177   : > { %v1621_v10 = vpop.f32.mrf.mxu0 }
 0x178   : > { %v652_v15 = vadd.f32 %v1621_v10, %v1521_v11 }
 0x179   : > { %v646_v12 = vpop.f32.mrf.mxu0 }
 0x17a   : > { %v647_v13 = vadd.f32 %v1521_v11, %v646_v12  ;;  %v666_v23 = vmax.f32 %v652_v15, 0.0 }
 0x17b   : > { %v1624_v14 = vpop.f32.mrf.mxu0 }
 0x17c   : > { %v665_v16 = vmax.f32 %v647_v13, 0.0  ;;  %v662_v27 = vadd.f32 %v1624_v14, %v1521_v11 }
 0x17d   : > { %v656_v19 = vpop.f32.mrf.mxu0 }
 0x17e   : > { %778 = vmatmul.mubr.f32.vlgmr.msra.gmra.mxu1 %v665_v16  ;;  %v657_v21 = vadd.f32 %v1521_v11, %v656_v19  ;;  %v668_v32 = vmax.f32 %v662_v27, 0.0  ;;  %v954_v19 = vld [vmem:[%s2693_s9] sm:$0x3] }
 0x17f   : > { %967 = vmatpush1.msra.mxu1 %v952_v17  ;;  %783 = vmatprep.mubr.f32.mxu1 %v2122_v8 }
 0x180   : > { %968 = vmatprep.subr.mxu1 %v951_v18  ;;  %v667_v28 = vmax.f32 %v657_v21, 0.0  ;;  %v959_v21 = vrot.slane %v954_v19, %v705_v5 }
 0x181   : > { %969 = vmatpush1.msra.mxu1 %v950_v20  ;;  %v709_v20 = vsub.s32 1, %v704_v4 }
 0x182   : > { %784 = vmatmul.mubr.f32.gmra.mxu1 %v666_v23  ;;  %970 = vmatprep.subr.mxu1 %v949_v22 }
 0x183   : > { %971 = vmatpush1.msra.mxu1 %v948_v24  ;;  %789 = vmatprep.mubr.f32.mxu1 %v2122_v8  ;;  %v710_v23 = vrot.slane %v701_v6, %v709_v20  ;;  %v963_v24 = vrot.slane %v954_v19, %v709_v20 }
 0x184   : > { %972 = vmatprep.subr.mxu1 %v947_v25 }
 0x185   : > { %973 = vmatpush1.msra.mxu1 %v946_v26 }
 0x186   : > { %974 = vmatprep.subr.mxu1 %v945_v29  ;;  %790 = vmatmul.mubr.f32.gmra.mxu1 %v667_v28 }
 0x187   : > { %975 = vmatpush1.msra.mxu1 %v944_v30  ;;  %795 = vmatprep.mubr.f32.mxu1 %v2122_v8 }
 0x188   : > { %976 = vmatprep.subr.mxu1 %v943_v31 }
 0x189   : > { %977 = vmatpush1.msra.mxu1 %v942_v33 }
 0x18a   : > { %978 = vmatprep.subr.mxu1 %v941_v34  ;;  %796 = vmatmul.mubr.f32.gmra.mxu1 %v668_v32 }
 0x18b   : > { %979 = vmatpush1.msra.mxu1 %v940_v35  ;;  %1030 = vmatprep.mubr.f32.mxu1 %v2122_v8 }
 0x18c   : > { %980 = vmatprep.subr.mxu1 %v939_v36 }
 0x18d   : > { %981 = vmatpush1.msra.mxu1 %v938_v37 }
 0x18e   : > { %982 = vmatprep.subr.mxu1 %v937_v38 }
 0x18f   : > { %983 = vmatpush1.msra.mxu1 %v936_v39 }
 0x190   : > { %984 = vmatprep.subr.mxu1 %v935_v40 }
 0x191   : > { %985 = vmatpush1.msra.mxu1 %v934_v41 }
 0x192   : > { %986 = vmatprep.subr.mxu1 %v933_v42 }
 0x193   : > { %987 = vmatpush1.msra.mxu1 %v932_v43 }
 0x194   : > { %988 = vmatprep.subr.mxu1 %v931_v44 }
 0x195   : > { %989 = vmatpush1.msra.mxu1 %v930_v45 }
 0x196   : > { %990 = vmatprep.subr.mxu1 %v929_v46 }
 0x197   : > { %v1659_v50 = vpop.f32.mrf.mxu0  ;;  %991 = vmatpush1.msra.mxu1 %v928_v47 }
 0x198   : > { %992 = vmatprep.subr.mxu1 %v927_v48  ;;  %v905_v59 = vadd.f32 %v1659_v50, %v1522_v53 }
 0x199   : > { %v899_v54 = vpop.f32.mrf.mxu0  ;;  %993 = vmatpush1.msra.mxu1 %v926_v49 }
 0x19a   : > { %v900_v56 = vadd.f32 %v1522_v53, %v899_v54  ;;  %994 = vmatprep.subr.mxu1 %v925_v51  ;;  %v919_v62 = vmax.f32 %v905_v59, 0.0 }
 0x19b   : > { %995 = vmatpush1.msra.mxu1 %v924_v52  ;;  %v1662_v58 = vpop.f32.mrf.mxu0 }
 0x19c   : > { %v918_v60 = vmax.f32 %v900_v56, 0.0  ;;  %996 = vmatprep.subr.mxu1 %v923_v55  ;;  %v915_v0 = vadd.f32 %v1662_v58, %v1522_v53 }
 0x19d   : > { %997 = vmatpush1.msra.mxu1 %v922_v57  ;;  %v909_v61 = vpop.f32.mrf.mxu0 }
 0x19e   : > { %1031 = vmatmul.mubr.f32.vlgmr.msra.gmra.mxu1 %v918_v60  ;;  %v910_v63 = vadd.f32 %v1522_v53, %v909_v61  ;;  %v921_v2 = vmax.f32 %v915_v0, 0.0 }
 0x19f   : > { %1036 = vmatprep.mubr.f32.mxu1 %v2122_v8 }
 0x1a0   : > { %v920_v1 = vmax.f32 %v910_v63, 0.0 }
 0x1a2   : > { %1037 = vmatmul.mubr.f32.gmra.mxu1 %v919_v62 }
 0x1a3   : > { %1042 = vmatprep.mubr.f32.mxu1 %v2122_v8 }
 0x1a6   : > { %1043 = vmatmul.mubr.f32.gmra.mxu1 %v920_v1 }
 0x1a7   : > { %1048 = vmatprep.mubr.f32.mxu1 %v2122_v8 }
 0x1aa   : > { %1049 = vmatmul.mubr.f32.gmra.mxu1 %v921_v2 }
 0x23e   : > { %v779_v9 = vpop.f32.mrf.mxu1 }
 0x23f   : > { %v780_v10 = vadd.f32 %v779_v9, %v706_v7 }
 0x240   : > { %v781_v11 = vpop.f32.mrf.mxu1 }
 0x241   : > { %802 = vst [vmem:[%s2462_s12] sm:$0xff] %v780_v10  ;;  %v2471_v28 = vadd.f32 %v781_v11, %v710_v23 }
 0x242   : > { %v785_v8 = vpop.f32.mrf.mxu1 }
 0x243   : > { %v786_v12 = vadd.f32 %v785_v8, %v706_v7 }
 0x244   : > { %v787_v13 = vpop.f32.mrf.mxu1 }
 0x245   : > { %803 = vst [vmem:[%s2462_s12 + $0x8] sm:$0xff] %v786_v12  ;;  %v2482_v35 = vadd.f32 %v787_v13, %v710_v23 }
 0x246   : > { %v791_v14 = vpop.f32.mrf.mxu1 }
 0x247   : > { %v792_v15 = vadd.f32 %v791_v14, %v706_v7 }
 0x248   : > { %v793_v16 = vpop.f32.mrf.mxu1 }
 0x249   : > { %804 = vst [vmem:[%s2462_s12 + $0x10] sm:$0xff] %v792_v15  ;;  %v2491_v42 = vadd.f32 %v793_v16, %v710_v23 }
 0x24a   : > { %v797_v17 = vpop.f32.mrf.mxu1 }
 0x24b   : > { %v798_v18 = vadd.f32 %v797_v17, %v706_v7 }
 0x24c   : > { %v799_v22 = vpop.f32.mrf.mxu1 }
 0x24d   : > { %805 = vst [vmem:[%s2462_s12 + $0x18] sm:$0xff] %v798_v18  ;;  %v2500_v49 = vadd.f32 %v799_v22, %v710_v23  ;;  %v2125_v23 = vmov 0   ;;  %s1978_s12 = sshll.u32 %s2128_s4, 4  ;;  %s1979_s12 = int_to_ptr.vmem [resolvable:$false] %s1978_s12 }
 0x24e   : > { %1777 = vset.pattern.permute.xlu1 %v2125_v23  ;;  %s1980_s20 = scalar_lea.vmem %s1979_s12, 1024  ;;  %p1981_p4 = scmp.lt.s32.totalorder %s2544_s16, %s1979_s12 }
 0x24f   : > { %p1982_p6 = scmp.lt.s32.totalorder %s1980_s20, %s1974_s2 }
 0x251   : > { %p1983_p1 = por %p1982_p6, %p1981_p4 }
 0x253   : > { %p1984_p5 = pnand %p1983_p1, %p1977_p2 }
 0x25e   : > { %v1032_v25 = vpop.f32.mrf.mxu1 }
 0x25f   : > { %v1033_v26 = vadd.f32 %v1032_v25, %v959_v21 }
 0x260   : > { %v1034_v27 = vpop.f32.mrf.mxu1 }
 0x261   : > { %1055 = vst [vmem:[%s2474_s28] sm:$0xff] %v1033_v26  ;;  %v2477_v29 = vadd.f32 %v1034_v27, %v963_v24  ;;  %v2126_v27 = vmov 2  }
 0x262   : > { %v1038_v30 = vpop.f32.mrf.mxu1  ;;  %1778 = vset.pattern.permute.xlu0 %v2126_v27 }
 0x263   : > { %v1523_v31 = vmul.f32 -1.442695, %v2477_v29  ;;  %v1039_v32 = vadd.f32 %v1038_v30, %v959_v21  ;;  %v1103_v33 = vsub.f32 %v2471_v28, %v2477_v29 }
 0x264   : > { %v1040_v34 = vpop.f32.mrf.mxu1 }
 0x265   : > { %1782 = vpow2.f32 %v1523_v31  ;;  %1056 = vst [vmem:[%s2474_s28 + $0x8] sm:$0xff] %v1039_v32  ;;  %v2485_v36 = vadd.f32 %v1040_v34, %v963_v24  ;;  %1111 = vrot.lane.b32.xlu0 %v1103_v33, %s2123_s19 }
 0x266   : > { %v1044_v37 = vpop.f32.mrf.mxu1 }
 0x267   : > { %v1524_v38 = vmul.f32 -1.442695, %v2485_v36  ;;  %v1045_v39 = vadd.f32 %v1044_v37, %v959_v21  ;;  %v1104_v40 = vsub.f32 %v2482_v35, %v2485_v36 }
 0x268   : > { %v1046_v41 = vpop.f32.mrf.mxu1 }
 0x269   : > { %1784 = vpow2.f32 %v1524_v38  ;;  %1057 = vst [vmem:[%s2474_s28 + $0x10] sm:$0xff] %v1045_v39  ;;  %v2494_v43 = vadd.f32 %v1046_v41, %v963_v24  ;;  %1113 = vrot.lane.b32.xlu0 %v1104_v40, %s2123_s19 }
 0x26a   : > { %v1050_v44 = vpop.f32.mrf.mxu1 }
 0x26b   : > { %v1525_v45 = vmul.f32 -1.442695, %v2494_v43  ;;  %v1051_v46 = vadd.f32 %v1050_v44, %v959_v21  ;;  %v1105_v47 = vsub.f32 %v2491_v42, %v2494_v43 }
 0x26c   : > { %v1052_v48 = vpop.f32.mrf.mxu1 }
 0x26d   : > { %1786 = vpow2.f32 %v1525_v45  ;;  %1058 = vst [vmem:[%s2474_s28 + $0x18] sm:$0xff] %v1051_v46  ;;  %v2503_v50 = vadd.f32 %v1052_v48, %v963_v24  ;;  %1115 = vrot.lane.b32.xlu1 %v1105_v47, %s2123_s19 }
 0x26f   : > { %v1526_v51 = vmul.f32 -1.442695, %v2503_v50  ;;  %v1106_v52 = vsub.f32 %v2500_v49, %v2503_v50 }
 0x271   : > { %1788 = vpow2.f32 %v1526_v51  ;;  %1117 = vrot.lane.b32.xlu1 %v1106_v52, %s2123_s19 }
 0x272   : > { %v1783_v53 = vpop.eup %1782 }
 0x273   : > { %v1071_v54 = vadd.f32 1.0, %v1783_v53 }
 0x275   : > { %1790 = vrcp.f32 %v1071_v54 }
 0x276   : > { %v1785_v55 = vpop.eup %1784 }
 0x277   : > { %v1072_v56 = vadd.f32 1.0, %v1785_v55 }
 0x279   : > { %1792 = vrcp.f32 %v1072_v56 }
 0x27a   : > { %v1787_v57 = vpop.eup %1786 }
 0x27b   : > { %v1073_v58 = vadd.f32 1.0, %v1787_v57 }
 0x27d   : > { %1794 = vrcp.f32 %v1073_v58 }
 0x27e   : > { %v1789_v59 = vpop.eup %1788 }
 0x27f   : > { %v1074_v60 = vadd.f32 1.0, %v1789_v59 }
 0x281   : > { %1796 = vrcp.f32 %v1074_v60 }
 0x282   : > { %v2510_v61 = vpop.eup %1790 }
 0x283   : > { %1087 = vrot.lane.b32.xlu0 %v2510_v61, %s2123_s19 }
 0x286   : > { %v2514_v62 = vpop.eup %1792 }
 0x287   : > { %1089 = vrot.lane.b32.xlu1 %v2514_v62, %s2123_s19 }
 0x28a   : > { %v2518_v63 = vpop.eup %1794 }
 0x28b   : > { %1091 = vrot.lane.b32.xlu0 %v2518_v63, %s2123_s19 }
 0x28e   : > { %v2522_v0 = vpop.eup %1796 }
 0x28f   : > { %1093 = vrot.lane.b32.xlu1 %v2522_v0, %s2123_s19 }
 0x2d7   : > { %v1112_v1 = vpop.permute.xlu0 %1111 }
 0x2d8   : > { %v1123_v2 = vmul.f32 %v1112_v1, %v2477_v29 }
 0x2da   : > { %v1527_v4 = vmul.f32 -1.442695, %v1123_v2 }
 0x2db   : > { %v1114_v5 = vpop.permute.xlu0 %1113 }
 0x2dc   : > { %1798 = vpow2.f32 %v1527_v4  ;;  %v1124_v6 = vmul.f32 %v1114_v5, %v2485_v36 }
 0x2de   : > { %v1528_v7 = vmul.f32 -1.442695, %v1124_v6 }
 0x2df   : > { %v1116_v9 = vpop.permute.xlu1 %1115 }
 0x2e0   : > { %1800 = vpow2.f32 %v1528_v7  ;;  %v1125_v10 = vmul.f32 %v1116_v9, %v2494_v43 }
 0x2e2   : > { %v1529_v11 = vmul.f32 -1.442695, %v1125_v10 }
 0x2e3   : > { %v1118_v8 = vpop.permute.xlu1 %1117 }
 0x2e4   : > { %1802 = vpow2.f32 %v1529_v11  ;;  %v1126_v12 = vmul.f32 %v1118_v8, %v2503_v50 }
 0x2e6   : > { %v1530_v13 = vmul.f32 -1.442695, %v1126_v12 }
 0x2e8   : > { %1804 = vpow2.f32 %v1530_v13 }
 0x2e9   : > { %v1799_v14 = vpop.eup %1798 }
 0x2ea   : > { %v1139_v15 = vadd.f32 1.0, %v1799_v14 }
 0x2ec   : > { %1806 = vrcp.f32 %v1139_v15 }
 0x2ed   : > { %v1801_v16 = vpop.eup %1800 }
 0x2ee   : > { %v1140_v17 = vadd.f32 1.0, %v1801_v16 }
 0x2f0   : > { %1808 = vrcp.f32 %v1140_v17 }
 0x2f1   : > { %v1803_v18 = vpop.eup %1802 }
 0x2f2   : > { %v1141_v19 = vadd.f32 1.0, %v1803_v18 }
 0x2f4   : > { %1810 = vrcp.f32 %v1141_v19 }
 0x2f5   : > { %v1805_v20 = vpop.eup %1804  ;;  %v1088_v30 = vpop.permute.xlu0 %1087 }
 0x2f6   : > { %v1142_v21 = vadd.f32 1.0, %v1805_v20  ;;  %v1099_v33 = vsub.f32 %v2510_v61, %v1088_v30 }
 0x2f8   : > { %1812 = vrcp.f32 %v1142_v21 }
 0x2f9   : > { %v1807_v22 = vpop.eup %1806  ;;  %v1090_v31 = vpop.permute.xlu1 %1089 }
 0x2fa   : > { %1155 = vrot.lane.b32.xlu0 %v1807_v22, %s2124_s26  ;;  %v1100_v39 = vsub.f32 %v2514_v62, %v1090_v31 }
 0x2fd   : > { %v1809_v24 = vpop.eup %1808  ;;  %v1092_v32 = vpop.permute.xlu0 %1091 }
 0x2fe   : > { %1157 = vrot.lane.b32.xlu1 %v1809_v24, %s2124_s26  ;;  %v1101_v44 = vsub.f32 %v2518_v63, %v1092_v32 }
 0x301   : > { %v1811_v25 = vpop.eup %1810  ;;  %v1094_v34 = vpop.permute.xlu1 %1093 }
 0x302   : > { %1159 = vrot.lane.b32.xlu0 %v1811_v25, %s2124_s26  ;;  %v1102_v47 = vsub.f32 %v2522_v0, %v1094_v34 }
 0x305   : > { %v1813_v26 = vpop.eup %1812 }
 0x306   : > { %1161 = vrot.lane.b32.xlu1 %v1813_v26, %s2124_s26 }
 0x36c   : > { %v1156_v37 = vpop.permute.xlu0 %1155 }
 0x36d   : > { %v1167_v38 = vmul.f32 %v1156_v37, %v1099_v33 }
 0x36f   : > { %1175 = vrot.lane.b32.xlu0 %v1167_v38, %s2127_s30 }
 0x370   : > { %v1158_v40 = vpop.permute.xlu1 %1157 }
 0x371   : > { %v1168_v41 = vmul.f32 %v1158_v40, %v1100_v39 }
 0x373   : > { %1177 = vrot.lane.b32.xlu1 %v1168_v41, %s2127_s30 }
 0x374   : > { %v1160_v45 = vpop.permute.xlu0 %1159 }
 0x375   : > { %v1169_v46 = vmul.f32 %v1160_v45, %v1101_v44 }
 0x377   : > { %1179 = vrot.lane.b32.xlu0 %v1169_v46, %s2127_s30 }
 0x378   : > { %v1162_v48 = vpop.permute.xlu1 %1161 }
 0x379   : > { %v1170_v51 = vmul.f32 %v1162_v48, %v1102_v47 }
 0x37b   : > { %1181 = vrot.lane.b32.xlu1 %v1170_v51, %s2127_s30 }
 0x37f   : > { %1221 = vperm.xlu1 %1777, %v2471_v28  }
 0x383   : > { %1779 = vset.pattern.permute.xlu1 %v2126_v27 }
 0x3e1   : > { %v1176_v52 = vpop.permute.xlu0 %1175 }
 0x3e2   : > { %v1187_v53 = vadd.f32 %v2510_v61, %v1176_v52 }
 0x3e4   : > { %1196 = vperm.xlu0 %1778, %v1187_v53  }
 0x3e5   : > { %v1178_v54 = vpop.permute.xlu1 %1177 }
 0x3e6   : > { %v1188_v55 = vadd.f32 %v2514_v62, %v1178_v54 }
 0x3e8   : > { %1201 = vperm.xlu1 %1779, %v1188_v55  }
 0x3e9   : > { %v1180_v56 = vpop.permute.xlu0 %1179 }
 0x3ea   : > { %v1189_v57 = vadd.f32 %v2518_v63, %v1180_v56 }
 0x3ec   : > { %1206 = vperm.xlu1 %1779, %v1189_v57  }
 0x3ed   : > { %v1182_v58 = vpop.permute.xlu1 %1181 }
 0x3ee   : > { %v1190_v28 = vadd.f32 %v2522_v0, %v1182_v58 }
 0x3f0   : > { %1211 = vperm.xlu0 %1778, %v1190_v28   ;;  %1781 = vset.pattern.permute.xlu1 %v2125_v23 }
 0x3f1   : > { %1231 = vperm.xlu1 %1781, %v2491_v42  }
 0x3f2   : > { %1987 = shalt.err (!%p1984_p5)
}
 0x3f3   : > { %s1988_s25 = scalar_lea.hbm %s2555_s17, 512  ;;  %s1992_s28 = scalar_lea.hbm %s2695_s11, 1024 }
 0x3f4   : > { %p1989_p8 = scmp.ne.s32.totalorder %s2555_s17, %s1988_s25  ;;  %p1993_p12 = scmp.lt.s32.totalorder %s2555_s17, %s2695_s11 }
 0x3f5   : > { %p1994_p7 = scmp.lt.s32.totalorder %s1992_s28, %s1988_s25 }
 0x3f6   : > { %p1990_p11 = pnand %p1989_p8, %p2741_p10 }
 0x3f7   : > { %p1995_p9 = por %p1994_p7, %p1993_p12 }
 0x3f8   : > { %p1991_p13 = pneg %p1990_p11 }
 0x3fa   : > { %p1996_p0 = pnand %p1995_p9, %p1991_p13 }
 0x3fc   : > { %1999 = shalt.err (!%p1996_p0)
}
 0x3fd   : > { %s2129_s30 = smov 128   ;;  %s2130_s27 = smov 8   ;;  %1780 = vset.pattern.permute.xlu0 %v2125_v23  ;;  %1236 = vperm.xlu1 %1781, %v2500_v49  }
 0x3fe   : > { %1684 = dma.vmem_to_hbm [thread:$0]  (%p2741_p10), %s2544_s16, 512, %s2555_s17, %s2559_s14, %s2129_s30, %s2129_s30, %s2130_s27   ;;  %1226 = vperm.xlu0 %1780, %v2482_v35  }
 0x3ff   : > { %s2592_s4 = scalar_lea.hbm %s2694_s10, %s2548_s13  ;;  %s1248_s12 = scalar_lea.sflag [#allocation4], %s2400_s21 }
 0x400   : > { %s2000_s20 = scalar_lea.vmem %s2542_s8, 512  ;;  %s2131_s25 = smov [#allocation13]  }
 0x401   : > { %p2001_p3 = scmp.ne.s32.totalorder %s2542_s8, %s2000_s20  ;;  %s2004_s29 = sshll.u32 %s2131_s25, 4  ;;  %s2005_s29 = int_to_ptr.vmem [resolvable:$false] %s2004_s29 }
 0x402   : > { %s2006_s16 = scalar_lea.vmem %s2005_s29, 1024  ;;  %p2007_p6 = scmp.lt.s32.totalorder %s2542_s8, %s2005_s29 }
 0x403   : > { %p2002_p2 = pnand %p2001_p3, %p2741_p10  ;;  %p2008_p1 = scmp.lt.s32.totalorder %s2006_s16, %s2000_s20 }
 0x405   : > { %p2003_p4 = pneg %p2002_p2  ;;  %p2009_p5 = por %p2008_p1, %p2007_p6 }
 0x407   : > { %p2010_p8 = pnand %p2009_p5, %p2003_p4 }
 0x409   : > { %2013 = shalt.err (!%p2010_p8)
}
 0x40a   : > { %s2014_s17 = scalar_lea.hbm %s2592_s4, 512  ;;  %s2018_s28 = scalar_lea.hbm %s2694_s10, 1024 }
 0x40b   : > { %p2015_p11 = scmp.ne.s32.totalorder %s2592_s4, %s2014_s17  ;;  %p2019_p7 = scmp.lt.s32.totalorder %s2592_s4, %s2694_s10 }
 0x40c   : > { %p2020_p9 = scmp.lt.s32.totalorder %s2018_s28, %s2014_s17 }
 0x40d   : > { %p2016_p13 = pnand %p2015_p11, %p2741_p10 }
 0x40e   : > { %p2021_p0 = por %p2020_p9, %p2019_p7 }
 0x40f   : > { %p2017_p12 = pneg %p2016_p13 }
 0x411   : > { %p2022_p3 = pnand %p2021_p0, %p2017_p12 }
 0x413   : > { %2025 = shalt.err (!%p2022_p3)
}
 0x414   : > { %1683 = dma.vmem_to_hbm [thread:$0]  (%p2741_p10), %s2542_s8, 512, %s2592_s4, %s1248_s12, %s2129_s30, %s2129_s30, %s2130_s27   ;;  %v1192_v35 = vand.u32 127, %v703_v3  ;;  %v1222_v42 = vpop.permute.xlu1 %1221 }
 0x415   : > { %s547_s18 = scalar_lea.vmem [#allocation16], %s2403_s23  ;;  %s2742_s4 = sld [smem:[#allocation33_spill]] }
 0x416   : > { %vm1193_vm0 = vcmp.eq.s32.totalorder %v1192_v35, 4  ;;  %vm1218_vm1 = vcmp.eq.s32.totalorder %v1192_v35, 5  ;;  %s1303_s8 = sshll.u32 %s547_s18, 4  ;;  %s2132_s25 = smov [#allocation16]   ;;  %s2626_s8 = int_to_ptr.vmem [resolvable:$true] %s1303_s8 }
 0x417   : > { %s2026_s20 = scalar_lea.vmem %s2626_s8, 512  ;;  %s2030_s29 = sshll.u32 %s2132_s25, 4  ;;  %s2031_s29 = int_to_ptr.vmem [resolvable:$false] %s2030_s29 }
 0x418   : > { %p2027_p2 = scmp.ne.s32.totalorder %s2626_s8, %s2026_s20  ;;  %s2032_s16 = scalar_lea.vmem %s2031_s29, 1024 }
 0x419   : > { %p2033_p1 = scmp.lt.s32.totalorder %s2626_s8, %s2031_s29  ;;  %p2034_p5 = scmp.lt.s32.totalorder %s2032_s16, %s2026_s20 }
 0x41a   : > { %p2028_p4 = pnand %p2027_p2, %p2741_p10 }
 0x41b   : > { %s2636_s12 = scalar_lea.hbm %s2742_s4, %s2548_s13  ;;  %p2035_p8 = por %p2034_p5, %p2033_p1 }
 0x41c   : > { %p2029_p6 = pneg %p2028_p4 }
 0x41e   : > { %p2036_p11 = pnand %p2035_p8, %p2029_p6 }
 0x45f   : > { %v1197_v49 = vpop.permute.xlu0 %1196 }
 0x460   : > { %v1214_v59 = vsel %vm1193_vm0, %v1197_v49, %v2477_v29 }
 0x461   : > { %v1239_v60 = vsel %vm1218_vm1, %v1222_v42, %v1214_v59 }
 0x462   : > { %1243 = vst [vmem:[%s547_s18] sm:$0xff] %v1239_v60 }
 0x463   : > { %v1202_v61 = vpop.permute.xlu1 %1201 }
 0x464   : > { %v1215_v29 = vsel %vm1193_vm0, %v1202_v61, %v2485_v36 }
 0x467   : > { %v1207_v62 = vpop.permute.xlu1 %1206 }
 0x468   : > { %v1216_v0 = vsel %vm1193_vm0, %v1207_v62, %v2494_v43 }
 0x46b   : > { %v1212_v63 = vpop.permute.xlu0 %1211 }
 0x46c   : > { %v1232_v1 = vpop.permute.xlu1 %1231  ;;  %v1217_v2 = vsel %vm1193_vm0, %v1212_v63, %v2503_v50 }
 0x46d   : > { %v1241_v3 = vsel %vm1218_vm1, %v1232_v1, %v1216_v0 }
 0x46e   : > { %1245 = vst [vmem:[%s547_s18 + $0x10] sm:$0xff] %v1241_v3 }
 0x478   : > { %v1237_v4 = vpop.permute.xlu1 %1236 }
 0x479   : > { %v1227_v5 = vpop.permute.xlu0 %1226  ;;  %v1242_v43 = vsel %vm1218_vm1, %v1237_v4, %v1217_v2 }
 0x47a   : > { %v1240_v6 = vsel %vm1218_vm1, %v1227_v5, %v1215_v29  ;;  %1246 = vst [vmem:[%s547_s18 + $0x18] sm:$0xff] %v1242_v43 }
 0x47b   : > { %1244 = vst [vmem:[%s547_s18 + $0x8] sm:$0xff] %v1240_v6 }
 0x47c   : > { %2039 = shalt.err (!%p2036_p11)
}
 0x47d   : > { %s2040_s13 = scalar_lea.hbm %s2636_s12, 512  ;;  %s2044_s6 = scalar_lea.hbm %s2742_s4, 1024 }
 0x47e   : > { %p2041_p13 = scmp.ne.s32.totalorder %s2636_s12, %s2040_s13  ;;  %p2045_p9 = scmp.lt.s32.totalorder %s2636_s12, %s2742_s4 }
 0x47f   : > { %p2046_p0 = scmp.lt.s32.totalorder %s2044_s6, %s2040_s13 }
 0x480   : > { %p2042_p12 = pnand %p2041_p13, %p2741_p10 }
 0x481   : > { %p2047_p3 = por %p2046_p0, %p2045_p9 }
 0x482   : > { %p2043_p7 = pneg %p2042_p12 }
 0x484   : > { %p2048_p2 = pnand %p2047_p3, %p2043_p7 }
 0x486   : > { %2051 = shalt.err (!%p2048_p2)
}
 0x487   : > { %1685 = dma.vmem_to_hbm [thread:$0]  (%p2741_p10), %s2626_s8, 512, %s2636_s12, %s2559_s14, %s2129_s30, %s2129_s30, %s2130_s27  }
 0x488 PF: > { %s2743_s26 = sld [smem:[#allocation24_spill]]  ;;  %p2746_p6 = scmp.ge.s32.totalorder %s2110_s24, 2 }
 0x489   : > { %s2744_s18 = sld [smem:[#allocation26_spill]] }
 0x48e   : > { %s1318_s23 = sand.u32 1, %s2743_s26  }
 0x48f   : > { %p2745_p4 = scmp.ne.s32.totalorder %s2744_s18, 0  ;;  %s1319_s2 = scalar_lea.sflag [#allocation4], %s1318_s23 }
 0x491   : > { %p1710_p1 = pnand %p2746_p6, %p2745_p4 }
 0x493   : > { %p1711_p5 = pneg %p1710_p1 }
 0x495   : > { %2089 = dma.done.wait (%p1711_p5), %s1319_s2, 512  }
 0x496   : > { %2091 = vsyncadd (%p1711_p5), %s1319_s2, 4294966784  ;;  %s2747_s15 = sadd.s32 4294967294, %s2110_s24  }
 0x497   : > { %s1327_s20 = sand.u32 1, %s2747_s15  }
 0x498   : > { %s1328_s25 = scalar_lea.sflag [#allocation15], %s1327_s20 }
 0x499   : > { %2093 = dma.done.wait (%p1711_p5), %s1328_s25, 1024  }
 0x49a   : > { %2095 = vsyncadd (%p1711_p5), %s1328_s25, 4294966272  ;;  %s2748_s24 = sld [smem:[#allocation27_spill]]  ;;  %s2751_s21 = smov %s2102_s22 }
 0x49b   : > { %s2749_s14 = sld [smem:[#allocation25_spill]] }
 0x49c   : > { %s2750_s23 = sld [smem:[#allocation28_spill]] }
 0x4a0   : > { %p34_p10 = scmp.ge.s32.totalorder %s2748_s24, 4  }
 0x4a1   : > { %s2752_s22 = smov %s2749_s14 }
 0x4a2   :  { %36 = sbr.rel (!%p34_p10) target bundleno = 17 (0x11), region = 166 }
 0x4a7   :  { %1342 = vsyncpa [#allocation3], 1 }
 0x4a8   :  { %1344 = vsyncpa [#allocation3 + $0x1], 1 }
 0x4a9   :  { %1345 = vsyncpa [#allocation6], 1 }
 0x4aa   :  { %1347 = vsyncpa [#allocation6 + $0x1], 1 }
 0x4ab   :  { %1348 = vsyncpa [#allocation9], 1 }
 0x4ac   :  { %1349 = vsyncpa [#allocation12], 1 }
 0x4ad   :  { %1350 = vsyncpa [#allocation4], 1 }
 0x4ae   :  { %1352 = vsyncpa [#allocation4 + $0x1], 1 }
 0x4af   :  { %1353 = vsyncpa [#allocation15], 1 }
 0x4b0   :  { %1355 = vsyncpa [#allocation15 + $0x1], 1 }

</bundles_post_ra>
